<compile_context>
chip_gen: v6e
topology: v6e:2x2x1
jax: 0.10.0
libtpu: 0.0.40
codegen_flags: <defaults>
</compile_context>

<pallas_src>
import jax
import jax.numpy as jnp
from jax.experimental import pallas as pl
from jax.experimental.pallas import tpu as pltpu

D_IN = 784        # 28 * 28
D_H = 512
D_LAT = 32
D_OUT = 784


def _round_up(v, m):
    return ((v + m - 1) // m) * m


def _cdiv(a, b):
    return (a + b - 1) // b


def vae_kernel(x_ref, eps_ref,
               w_fc_ref, b_fc_ref,
               w_mulv_ref, b_mulv_ref,
               w_d1_ref, b_d1_ref,
               w_d2_ref, b_d2_ref,
               out_ref):
    # ---- encoder ----
    x = x_ref[...].astype(jnp.bfloat16)                       # (TM, 784) bf16
    h = jnp.dot(x, w_fc_ref[...], preferred_element_type=jnp.float32)
    h = jnp.maximum(h + b_fc_ref[...], 0.0)                   # relu, (TM, 512) f32

    # fused mu / log_var: single (512, 64) bf16 matmul, split columns 0:32 / 32:64
    mulv = jnp.dot(h.astype(jnp.bfloat16), w_mulv_ref[...],
                   preferred_element_type=jnp.float32) + b_mulv_ref[...]
    z_mu = mulv[:, :D_LAT]
    z_lv = mulv[:, D_LAT:]
    z = z_mu + jnp.exp(0.5 * z_lv) * eps_ref[...]              # reparameterization, (TM, 32)

    # ---- decoder ----
    d = jnp.dot(z.astype(jnp.bfloat16), w_d1_ref[...],
                preferred_element_type=jnp.float32)
    d = jnp.maximum(d + b_d1_ref[...], 0.0)                    # relu, (TM, 512)

    y = jnp.dot(d.astype(jnp.bfloat16), w_d2_ref[...],
                preferred_element_type=jnp.float32) + b_d2_ref[...]
    out_ref[...] = jax.nn.sigmoid(y).astype(out_ref.dtype)     # (TM, 784) bf16


def vae_forward(x_nchw, eps, params, *, tm=512):
    """x_nchw: (B, 1, 28, 28) float (f32 or bf16); eps: (B, 32) f32 noise.

    Returns (B, 1, 28, 28) bfloat16 reconstruction (sigmoid output)."""
    B = x_nchw.shape[0]
    x_flat = x_nchw.reshape(B, -1)                   # same as torch x.view(B, -1)

    (w_fc, b_fc, w_mu, b_mu, w_lv, b_lv, w_d1, b_d1, w_d2, b_d2) = params

    # --- weight prep (layout / dtype decisions live in the wrapper) ---
    # all weights as bf16: halves weight DMA, single-pass bf16 MXU on every dot
    w_fc_bf = w_fc.astype(jnp.bfloat16)                               # (784, 512)
    w_mulv = jnp.concatenate([w_mu, w_lv], axis=1).astype(jnp.bfloat16)  # (512, 64)
    b_mulv = jnp.concatenate([b_mu, b_lv], axis=1)                    # (1, 64) f32
    w_d1_bf = w_d1.astype(jnp.bfloat16)                               # (32, 512)
    w_d2_bf = w_d2.astype(jnp.bfloat16)                               # (512, 784)

    # --- batch tiling ---
    # tiles multiple of 16 (bf16 output (16,128) sublane packing); force >= 2
    # grid steps so v7x megacore sharding has work for both TensorCores.
    tm_eff = max(16, min(tm, _round_up(_cdiv(B, 2), 16)))
    n_blk = max(2, _cdiv(B, tm_eff))
    B_pad = n_blk * tm_eff
    if B_pad != B:
        x_flat = jnp.pad(x_flat, ((0, B_pad - B), (0, 0)))
        eps = jnp.pad(eps, ((0, B_pad - B), (0, 0)))

    row_spec = lambda w: pl.BlockSpec((tm_eff, w), lambda i: (i, 0))
    resident = lambda shp: pl.BlockSpec(shp, lambda i: (0, 0))

    out_padded = pl.pallas_call(
        vae_kernel,
        out_shape=jax.ShapeDtypeStruct((B_pad, D_OUT), jnp.bfloat16),
        grid=(n_blk,),
        in_specs=[
            row_spec(D_IN),                      # x
            row_spec(D_LAT),                     # eps
            resident((D_IN, D_H)),               # w_fc   (bf16)
            resident((1, D_H)),                  # b_fc   (f32)
            resident((D_H, 2 * D_LAT)),          # w_mulv (bf16)
            resident((1, 2 * D_LAT)),            # b_mulv (f32)
            resident((D_LAT, D_H)),              # w_d1   (bf16)
            resident((1, D_H)),                  # b_d1   (f32)
            resident((D_H, D_OUT)),              # w_d2   (bf16)
            resident((1, D_OUT)),                # b_d2   (f32)
        ],
        out_specs=row_spec(D_OUT),
        compiler_params=pltpu.CompilerParams(
            dimension_semantics=("parallel",),
            vmem_limit_bytes=32 << 20,
        ),
    )(x_flat, eps,
      w_fc_bf, b_fc, w_mulv, b_mulv, w_d1_bf, b_d1, w_d2_bf, b_d2)

    out = out_padded if B_pad == B else out_padded[:B]
    return out.reshape(B, 1, 28, 28)


def init_linear(key, in_f, out_f):
    """PyTorch nn.Linear default init: U(-1/sqrt(in_f), 1/sqrt(in_f)).
    Weight returned already transposed to (in_f, out_f); bias as (1, out_f)."""
    kw, kb = jax.random.split(key)
    bound = 1.0 / jnp.sqrt(jnp.float32(in_f))
    w = jax.random.uniform(kw, (in_f, out_f), jnp.float32, -bound, bound)
    b = jax.random.uniform(kb, (1, out_f), jnp.float32, -bound, bound)
    return w, b


def reference_forward(x_nchw, eps, params):
    """Pure-JAX reference mirroring the kernel's dtype decisions (bf16 operands
    on all four matmuls, f32 accumulation, bf16 output)."""
    (w_fc, b_fc, w_mu, b_mu, w_lv, b_lv, w_d1, b_d1, w_d2, b_d2) = params
    B = x_nchw.shape[0]
    x = x_nchw.reshape(B, -1)
    h = jnp.dot(x.astype(jnp.bfloat16), w_fc.astype(jnp.bfloat16),
                preferred_element_type=jnp.float32)
    h = jnp.maximum(h + b_fc, 0.0)
    h_bf = h.astype(jnp.bfloat16)
    mu = jnp.dot(h_bf, w_mu.astype(jnp.bfloat16),
                 preferred_element_type=jnp.float32) + b_mu
    lv = jnp.dot(h_bf, w_lv.astype(jnp.bfloat16),
                 preferred_element_type=jnp.float32) + b_lv
    z = mu + jnp.exp(0.5 * lv) * eps
    d = jnp.dot(z.astype(jnp.bfloat16), w_d1.astype(jnp.bfloat16),
                preferred_element_type=jnp.float32)
    d = jnp.maximum(d + b_d1, 0.0)
    y = jnp.dot(d.astype(jnp.bfloat16), w_d2.astype(jnp.bfloat16),
                preferred_element_type=jnp.float32) + b_d2
    return jax.nn.sigmoid(y).astype(jnp.bfloat16).reshape(B, 1, 28, 28)


if __name__ == "__main__":
    key = jax.random.PRNGKey(0)
    k_x, k_eps, k1, k2, k3, k4, k5 = jax.random.split(key, 7)

    B = 8
    x = jax.random.normal(k_x, (B, 1, 28, 28), jnp.float32)
    # torch.zeros_like(z_std).normal_() -> standard normal noise; generated here
    # with JAX RNG and fed to the kernel so the reparameterization is explicit.
    eps = jax.random.normal(k_eps, (B, D_LAT), jnp.float32)

    params = (
        *init_linear(k1, D_IN, D_H),    # fc
        *init_linear(k2, D_H, D_LAT),   # fc_mu
        *init_linear(k3, D_H, D_LAT),   # fc_log_var
        *init_linear(k4, D_LAT, D_H),   # fc_decode1
        *init_linear(k5, D_H, D_OUT),   # fc_decode2
    )

    out = jax.block_until_ready(vae_forward(x, eps, params))
    ref = jax.block_until_ready(reference_forward(x, eps, params))

    assert out.shape == (B, 1, 28, 28)
    assert out.dtype == jnp.bfloat16
    err = float(jnp.max(jnp.abs(out.astype(jnp.float32) - ref.astype(jnp.float32))))
    assert err < 2e-2, err

    print("KERNEL_OK")
</pallas_src>

<mosaic_0001>
module attributes {stable_mosaic.version = 11 : i64} {
  func.func @vae_kernel(%arg0: i32, %arg1: memref<16x784xf32, #tpu.memory_space<vmem>>, %arg2: memref<16x32xf32, #tpu.memory_space<vmem>>, %arg3: memref<784x512xbf16, #tpu.memory_space<vmem>>, %arg4: memref<1x512xf32, #tpu.memory_space<vmem>>, %arg5: memref<512x64xbf16, #tpu.memory_space<vmem>>, %arg6: memref<1x64xf32, #tpu.memory_space<vmem>>, %arg7: memref<32x512xbf16, #tpu.memory_space<vmem>>, %arg8: memref<1x512xf32, #tpu.memory_space<vmem>>, %arg9: memref<512x784xbf16, #tpu.memory_space<vmem>>, %arg10: memref<1x784xf32, #tpu.memory_space<vmem>>, %arg11: memref<16x784xbf16, #tpu.memory_space<vmem>>) attributes {dimension_semantics = [#tpu.dimension_semantics<parallel>], iteration_bounds = array<i64: 2>, scalar_prefetch = 0 : i64, scratch_operands = 0 : i64, tpu.core_type = #tpu.core_type<tc>, window_params = [{transform_indices = @transform_0, window_bounds = array<i64: 16, 784>}, {transform_indices = @transform_1, window_bounds = array<i64: 16, 32>}, {pipeline_mode = #tpu.pipeline_mode<synchronous>, transform_indices = @transform_2, window_bounds = array<i64: 784, 512>}, {pipeline_mode = #tpu.pipeline_mode<synchronous>, transform_indices = @transform_3, window_bounds = array<i64: 1, 512>}, {pipeline_mode = #tpu.pipeline_mode<synchronous>, transform_indices = @transform_4, window_bounds = array<i64: 512, 64>}, {pipeline_mode = #tpu.pipeline_mode<synchronous>, transform_indices = @transform_5, window_bounds = array<i64: 1, 64>}, {pipeline_mode = #tpu.pipeline_mode<synchronous>, transform_indices = @transform_6, window_bounds = array<i64: 32, 512>}, {pipeline_mode = #tpu.pipeline_mode<synchronous>, transform_indices = @transform_7, window_bounds = array<i64: 1, 512>}, {pipeline_mode = #tpu.pipeline_mode<synchronous>, transform_indices = @transform_8, window_bounds = array<i64: 512, 784>}, {pipeline_mode = #tpu.pipeline_mode<synchronous>, transform_indices = @transform_9, window_bounds = array<i64: 1, 784>}, {transform_indices = @transform_10, window_bounds = array<i64: 16, 784>}]} {
    %c0 = arith.constant 0 : index
    %c0_0 = arith.constant 0 : index
    %0 = vector.load %arg1[%c0, %c0_0] : memref<16x784xf32, #tpu.memory_space<vmem>>, vector<16x784xf32>
    %1 = arith.truncf %0 : vector<16x784xf32> to vector<16x784xbf16>
    %c0_1 = arith.constant 0 : index
    %c0_2 = arith.constant 0 : index
    %2 = vector.load %arg3[%c0_1, %c0_2] : memref<784x512xbf16, #tpu.memory_space<vmem>>, vector<784x512xbf16>
    %cst = arith.constant dense<0.000000e+00> : vector<16x512xf32>
    %3 = tpu.matmul %1, %2, %cst {dimension_numbers = #tpu.dot_dimension_numbers<[1], [0], [0], [1], [0, 0, 1, 1], [], []>} : vector<16x784xbf16>, vector<784x512xbf16>, vector<16x512xf32> -> vector<16x512xf32>
    %c0_3 = arith.constant 0 : index
    %c0_4 = arith.constant 0 : index
    %4 = vector.load %arg4[%c0_3, %c0_4] : memref<1x512xf32, #tpu.memory_space<vmem>>, vector<1x512xf32>
    %5 = vector.broadcast %4 : vector<1x512xf32> to vector<16x512xf32>
    %6 = arith.addf %3, %5 : vector<16x512xf32>
    %cst_5 = arith.constant 0.000000e+00 : f32
    %7 = vector.broadcast %cst_5 : f32 to vector<16x512xf32>
    %8 = arith.maximumf %6, %7 : vector<16x512xf32>
    %9 = arith.truncf %8 : vector<16x512xf32> to vector<16x512xbf16>
    %c0_6 = arith.constant 0 : index
    %c0_7 = arith.constant 0 : index
    %10 = vector.load %arg5[%c0_6, %c0_7] : memref<512x64xbf16, #tpu.memory_space<vmem>>, vector<512x64xbf16>
    %cst_8 = arith.constant dense<0.000000e+00> : vector<16x64xf32>
    %11 = tpu.matmul %9, %10, %cst_8 {dimension_numbers = #tpu.dot_dimension_numbers<[1], [0], [0], [1], [0, 0, 1, 1], [], []>} : vector<16x512xbf16>, vector<512x64xbf16>, vector<16x64xf32> -> vector<16x64xf32>
    %c0_9 = arith.constant 0 : index
    %c0_10 = arith.constant 0 : index
    %12 = vector.load %arg6[%c0_9, %c0_10] : memref<1x64xf32, #tpu.memory_space<vmem>>, vector<1x64xf32>
    %13 = vector.broadcast %12 : vector<1x64xf32> to vector<16x64xf32>
    %14 = arith.addf %11, %13 : vector<16x64xf32>
    %15 = vector.extract_strided_slice %14 {offsets = [0, 0], sizes = [16, 32], strides = [1, 1]} : vector<16x64xf32> to vector<16x32xf32>
    %16 = vector.extract_strided_slice %14 {offsets = [0, 32], sizes = [16, 32], strides = [1, 1]} : vector<16x64xf32> to vector<16x32xf32>
    %cst_11 = arith.constant 5.000000e-01 : f32
    %17 = vector.broadcast %cst_11 : f32 to vector<16x32xf32>
    %18 = arith.mulf %17, %16 : vector<16x32xf32>
    %19 = math.exp %18 : vector<16x32xf32>
    %c0_12 = arith.constant 0 : index
    %c0_13 = arith.constant 0 : index
    %20 = vector.load %arg2[%c0_12, %c0_13] : memref<16x32xf32, #tpu.memory_space<vmem>>, vector<16x32xf32>
    %21 = arith.mulf %19, %20 : vector<16x32xf32>
    %22 = arith.addf %15, %21 : vector<16x32xf32>
    %23 = arith.truncf %22 : vector<16x32xf32> to vector<16x32xbf16>
    %c0_14 = arith.constant 0 : index
    %c0_15 = arith.constant 0 : index
    %24 = vector.load %arg7[%c0_14, %c0_15] : memref<32x512xbf16, #tpu.memory_space<vmem>>, vector<32x512xbf16>
    %cst_16 = arith.constant dense<0.000000e+00> : vector<16x512xf32>
    %25 = tpu.matmul %23, %24, %cst_16 {dimension_numbers = #tpu.dot_dimension_numbers<[1], [0], [0], [1], [0, 0, 1, 1], [], []>} : vector<16x32xbf16>, vector<32x512xbf16>, vector<16x512xf32> -> vector<16x512xf32>
    %c0_17 = arith.constant 0 : index
    %c0_18 = arith.constant 0 : index
    %26 = vector.load %arg8[%c0_17, %c0_18] : memref<1x512xf32, #tpu.memory_space<vmem>>, vector<1x512xf32>
    %27 = vector.broadcast %26 : vector<1x512xf32> to vector<16x512xf32>
    %28 = arith.addf %25, %27 : vector<16x512xf32>
    %cst_19 = arith.constant 0.000000e+00 : f32
    %29 = vector.broadcast %cst_19 : f32 to vector<16x512xf32>
    %30 = arith.maximumf %28, %29 : vector<16x512xf32>
    %31 = arith.truncf %30 : vector<16x512xf32> to vector<16x512xbf16>
    %c0_20 = arith.constant 0 : index
    %c0_21 = arith.constant 0 : index
    %32 = vector.load %arg9[%c0_20, %c0_21] : memref<512x784xbf16, #tpu.memory_space<vmem>>, vector<512x784xbf16>
    %cst_22 = arith.constant dense<0.000000e+00> : vector<16x784xf32>
    %33 = tpu.matmul %31, %32, %cst_22 {dimension_numbers = #tpu.dot_dimension_numbers<[1], [0], [0], [1], [0, 0, 1, 1], [], []>} : vector<16x512xbf16>, vector<512x784xbf16>, vector<16x784xf32> -> vector<16x784xf32>
    %c0_23 = arith.constant 0 : index
    %c0_24 = arith.constant 0 : index
    %34 = vector.load %arg10[%c0_23, %c0_24] : memref<1x784xf32, #tpu.memory_space<vmem>>, vector<1x784xf32>
    %35 = vector.broadcast %34 : vector<1x784xf32> to vector<16x784xf32>
    %36 = arith.addf %33, %35 : vector<16x784xf32>
    %37 = arith.negf %36 : vector<16x784xf32>
    %38 = math.exp %37 : vector<16x784xf32>
    %cst_25 = arith.constant 1.000000e+00 : f32
    %39 = vector.broadcast %cst_25 : f32 to vector<16x784xf32>
    %40 = arith.addf %39, %38 : vector<16x784xf32>
    %41 = arith.divf %39, %40 : vector<16x784xf32>
    %42 = arith.truncf %41 : vector<16x784xf32> to vector<16x784xbf16>
    %c0_26 = arith.constant 0 : index
    %c0_27 = arith.constant 0 : index
    %43 = vector.load %arg11[%c0_26, %c0_27] : memref<16x784xbf16, #tpu.memory_space<vmem>>, vector<16x784xbf16>
    tpu.vector_store %arg11[%c0_26, %c0_27], %42 {strides = array<i32>} : memref<16x784xbf16, #tpu.memory_space<vmem>>, vector<16x784xbf16>,
    return
  }
  func.func @transform_0(%arg0: i32) -> (i32, i32) {
    %c0_i32 = arith.constant 0 : i32
    %c0_i32_0 = arith.constant 0 : i32
    return %arg0, %c0_i32 : i32, i32
  }
  func.func @transform_1(%arg0: i32) -> (i32, i32) {
    %c0_i32 = arith.constant 0 : i32
    %c0_i32_0 = arith.constant 0 : i32
    return %arg0, %c0_i32 : i32, i32
  }
  func.func @transform_2(%arg0: i32) -> (i32, i32) {
    %c0_i32 = arith.constant 0 : i32
    %c0_i32_0 = arith.constant 0 : i32
    %c0_i32_1 = arith.constant 0 : i32
    return %c0_i32, %c0_i32_0 : i32, i32
  }
  func.func @transform_3(%arg0: i32) -> (i32, i32) {
    %c0_i32 = arith.constant 0 : i32
    %c0_i32_0 = arith.constant 0 : i32
    %c0_i32_1 = arith.constant 0 : i32
    return %c0_i32, %c0_i32_0 : i32, i32
  }
  func.func @transform_4(%arg0: i32) -> (i32, i32) {
    %c0_i32 = arith.constant 0 : i32
    %c0_i32_0 = arith.constant 0 : i32
    %c0_i32_1 = arith.constant 0 : i32
    return %c0_i32, %c0_i32_0 : i32, i32
  }
  func.func @transform_5(%arg0: i32) -> (i32, i32) {
    %c0_i32 = arith.constant 0 : i32
    %c0_i32_0 = arith.constant 0 : i32
    %c0_i32_1 = arith.constant 0 : i32
    return %c0_i32, %c0_i32_0 : i32, i32
  }
  func.func @transform_6(%arg0: i32) -> (i32, i32) {
    %c0_i32 = arith.constant 0 : i32
    %c0_i32_0 = arith.constant 0 : i32
    %c0_i32_1 = arith.constant 0 : i32
    return %c0_i32, %c0_i32_0 : i32, i32
  }
  func.func @transform_7(%arg0: i32) -> (i32, i32) {
    %c0_i32 = arith.constant 0 : i32
    %c0_i32_0 = arith.constant 0 : i32
    %c0_i32_1 = arith.constant 0 : i32
    return %c0_i32, %c0_i32_0 : i32, i32
  }
  func.func @transform_8(%arg0: i32) -> (i32, i32) {
    %c0_i32 = arith.constant 0 : i32
    %c0_i32_0 = arith.constant 0 : i32
    %c0_i32_1 = arith.constant 0 : i32
    return %c0_i32, %c0_i32_0 : i32, i32
  }
  func.func @transform_9(%arg0: i32) -> (i32, i32) {
    %c0_i32 = arith.constant 0 : i32
    %c0_i32_0 = arith.constant 0 : i32
    %c0_i32_1 = arith.constant 0 : i32
    return %c0_i32, %c0_i32_0 : i32, i32
  }
  func.func @transform_10(%arg0: i32) -> (i32, i32) {
    %c0_i32 = arith.constant 0 : i32
    %c0_i32_0 = arith.constant 0 : i32
    return %arg0, %c0_i32 : i32, i32
  }
}

</mosaic_0001>

<bundles_post_ra>
// kernel: tpu_custom_call.1
= control target key start
LH: loop header
LB: loop body
LE: loop exit
PB: predicated region body
PF: predicated region fallthrough
CT: control target
= control target key end

     0   :  { %15 = vsyncpa [#allocation3], 0  ;;  %s7634_s0 = inlined_call_operand.vmem [shape: f32[32,784], index: 0, kind: input, shape index: {}]   ;;  %s7635_s1 = inlined_call_operand.vmem [shape: f32[32,32], index: 1, kind: input, shape index: {}]   ;;  %s7636_s2 = inlined_call_operand.vmem [shape: bf16[784,512], index: 2, kind: input, shape index: {}]   ;;  %s7637_s3 = inlined_call_operand.vmem [shape: f32[1,512], index: 3, kind: input, shape index: {}]   ;;  %s7638_s4 = inlined_call_operand.vmem [shape: bf16[512,64], index: 4, kind: input, shape index: {}]   ;;  %s7639_s5 = inlined_call_operand.vmem [shape: f32[1,64], index: 5, kind: input, shape index: {}]   ;;  %s7640_s6 = inlined_call_operand.vmem [shape: bf16[32,512], index: 6, kind: input, shape index: {}]   ;;  %s7641_s7 = inlined_call_operand.vmem [shape: f32[1,512], index: 7, kind: input, shape index: {}]   ;;  %s7642_s8 = inlined_call_operand.vmem [shape: bf16[512,784], index: 8, kind: input, shape index: {}]   ;;  %s7643_s9 = inlined_call_operand.vmem [shape: f32[1,784], index: 9, kind: input, shape index: {}]   ;;  %s7644_s10 = inlined_call_operand.hbm [shape: bf16[32,784], index: 10, kind: output, shape index: {}]  }
   0x1   :  { %17 = vsyncpa [#allocation3 + $0x1], 0  ;;  %s6007_s13 = smov 0   ;;  %s6009_s14 = smov 0  }
   0x2   :  { %s6011_s15 = smov 0   ;;  %s6013_s16 = smov 0  }
   0x3 LB: > { %7646 = sst [smem:[#allocation5_spill]] %s5940_s15  ;;  %s6028_s17 = sadd.s32 4294967295, %s5944_s16   ;;  %s5944_s16 = sphi %s6013_s16, %s7655_s16   ;;  %s5940_s15 = sphi %s6011_s15, %s7654_s15   ;;  %s5936_s14 = sphi %s6009_s14, %s7653_s14   ;;  %s5932_s13 = sphi %s6007_s13, %s7652_s13  }
   0x4   : > { %s4523_s18 = sadd.s32 4294967294, %s5944_s16   ;;  %s6032_s19 = sadd.s32 1, %s5944_s16  }
   0x5   : > { %s250_s20 = sadd.s32 1, %s5940_s15  ;;  %s247_s21 = ssub.s32 %s5944_s16, %s6032_s19 }
   0x6   : > { %p260_p0 = scmp.ne.s32.totalorder %s5940_s15, %s5936_s14  ;;  %p248_p1 = scmp.eq.s32.totalorder %s247_s21, 0 }
   0x7   : > { %p261_p2 = scmp.eq.s32.totalorder %s6028_s17, 1  ;;  %p266_p3 = scmp.ne.s32.totalorder %s5936_s14, %s5932_s13 }
   0x8   : > { %p267_p4 = scmp.eq.s32.totalorder %s4523_s18, 1  ;;  %p4526_p7 = scmp.ge.s32.totalorder %s5944_s16, 1 }
   0x9   : > { %s6043_s22 = scalar_select %p248_p1, %s5940_s15, %s250_s20  }
   0xa   : > { %p6045_p5 = por %p261_p2, %p260_p0  ;;  %p6049_p6 = por %p267_p4, %p266_p3 }
   0xb   : > { %7647 = sst [smem:[#allocation6_spill]] %s6043_s22  ;;  %p328_p8 = scmp.lt.s32.totalorder %s5944_s16, 3 }
   0xd   : > { %p329_p9 = pnand %p4526_p7, %p328_p8 }
   0xe   : > { %s4527_s28 = sshll.u32 (!%p329_p9), %s6028_s17, 1  ;;  %s5947_s22 = smov (!%p329_p9), 32  }
   0xf   : > { %332 = sbr.rel (%p329_p9) target bundleno = 1391 (0x56f), region = 60  ;;  %p373_p10 = scmp.lt.s32.totalorder (!%p329_p9), %s4527_s28, 3 }
  0x10   : > { %s369_s26 = sand.u32 (!%p329_p9), 1, %s5936_s14  }
  0x11   : > { %s5119_s27 = smul.u32 (!%p329_p9), 56, %s369_s26 }
  0x13   : > { %s7563_s30 = scalar_lea.vmem (!%p329_p9), [#allocation2], %s5119_s27 }
  0x14   : > { %v5166_v0 = vld [vmem:[%s7636_s2 + $0xe4] ss:$16 sps:$4 sm:$0xff]   ;;  %v5170_v2 = vld [vmem:[%s7636_s2 + $0xe0] ss:$16 sps:$4 sm:$0xff]   ;;  %s7657_s28 = smov (!%p373_p10, %s4527_s28), 3  ;;  %vm1606_vm0 = vcmask 130048  }
  0x15   : > { %v5168_v1 = vld [vmem:[%s7636_s2 + $0x2e4] ss:$16 sps:$4 sm:$0xff]   ;;  %1610 = vmatprep.subr.bf16.mxu0 %v5166_v0  ;;  %v5171_v3 = vld [vmem:[%s7636_s2 + $0x2e0] ss:$16 sps:$4 sm:$0xff]   ;;  %s5120_s29 = smul.u32 56, %s7657_s28  ;;  %s4530_s11 = sshll.u32 %s7657_s28, 3 }
  0x16   : > { %1653 = vmatprep.subr.bf16.mxu1 %v5168_v1  ;;  %v5172_v4 = vld [vmem:[%s7636_s2 + $0xc4] ss:$16 sps:$4 sm:$0xff]   ;;  %1611 = vmatpush1.bf16.msra.mxu0 %v5170_v2  ;;  %v5176_v6 = vld [vmem:[%s7636_s2 + $0xc0] ss:$16 sps:$4 sm:$0xff]   ;;  %s383_s20 = scalar_lea.vmem %s7635_s1, %s4530_s11  ;;  %vm2410_vm1 = vcmask 261120   ;;  %vm4428_vm2 = vcmask 125952  }
  0x17   : > { %1654 = vmatpush1.bf16.msra.mxu1 %v5171_v3  ;;  %v5174_v5 = vld [vmem:[%s7636_s2 + $0x2c4] ss:$16 sps:$4 sm:$0xff]   ;;  %1612 = vmatprep.subr.bf16.mxu0 %v5172_v4  ;;  %v5177_v7 = vld [vmem:[%s7636_s2 + $0x2c0] ss:$16 sps:$4 sm:$0xff]   ;;  %s6194_s15 = scalar_lea.vmem %s7634_s0, %s5120_s29  ;;  %s5121_s11 = smul.u32 896, %s6028_s17 }
  0x18   : > { %1655 = vmatprep.subr.bf16.mxu1 %v5174_v5  ;;  %v5178_v8 = vld [vmem:[%s7636_s2 + $0xa4] ss:$16 sps:$4 sm:$0xff]   ;;  %v5182_v10 = vld [vmem:[%s7636_s2 + $0xa0] ss:$16 sps:$4 sm:$0xff]   ;;  %v388_v46 = vld [vmem:[%s6194_s15 + $0x8] sm:$0xff]  ;;  %s4449_s12 = sshll.u32 %s7563_s30, 4  ;;  %s7589_s12 = int_to_ptr.vmem [resolvable:$true] %s4449_s12 }
  0x19   : > { %v5180_v9 = vld [vmem:[%s7636_s2 + $0x2a4] ss:$16 sps:$4 sm:$0xff]   ;;  %v5183_v11 = vld [vmem:[%s7636_s2 + $0x2a0] ss:$16 sps:$4 sm:$0xff]   ;;  %v390_v48 = vld [vmem:[%s6194_s15 + $0x18] sm:$0xff]  ;;  %s7594_s28 = scalar_lea.sflag [#allocation3], %s369_s26 }
  0x1a   : > { %1613 = vmatpush1.bf16.msra.mxu0 %v5176_v6  ;;  %v5184_v12 = vld [vmem:[%s7636_s2 + $0x84] ss:$16 sps:$4 sm:$0xff]   ;;  %v5188_v14 = vld [vmem:[%s7636_s2 + $0x80] ss:$16 sps:$4 sm:$0xff]   ;;  %s5884_s17 = scalar_lea.vmem %s7589_s12, 896  ;;  %s5949_s29 = smov [#allocation2]  }
  0x1b   : > { %1656 = vmatpush1.bf16.msra.mxu1 %v5177_v7  ;;  %1614 = vmatprep.subr.bf16.mxu0 %v5178_v8  ;;  %v5186_v13 = vld [vmem:[%s7636_s2 + $0x284] ss:$16 sps:$4 sm:$0xff]   ;;  %v5189_v15 = vld [vmem:[%s7636_s2 + $0x280] ss:$16 sps:$4 sm:$0xff]   ;;  %v394_v7 = vld [vmem:[%s6194_s15 + $0x38] sm:$0xff]  ;;  %p5885_p11 = scmp.ne.s32.totalorder %s7589_s12, %s5884_s17  ;;  %s5888_s21 = sshll.u32 %s5949_s29, 4  ;;  %s5889_s21 = int_to_ptr.vmem [resolvable:$false] %s5888_s21 }
  0x1c   : > { %1657 = vmatprep.subr.bf16.mxu1 %v5180_v9  ;;  %v5190_v16 = vld [vmem:[%s7636_s2 + $0x64] ss:$16 sps:$4 sm:$0xff]   ;;  %v5194_v18 = vld [vmem:[%s7636_s2 + $0x60] ss:$16 sps:$4 sm:$0xff]   ;;  %v396_v9 = vld [vmem:[%s6194_s15 + $0x48] sm:$0xff]  ;;  %p5891_p0 = scmp.lt.s32.totalorder %s7589_s12, %s5889_s21 }
  0x1d   : > { %v5192_v17 = vld [vmem:[%s7636_s2 + $0x264] ss:$16 sps:$4 sm:$0xff]   ;;  %v5195_v19 = vld [vmem:[%s7636_s2 + $0x260] ss:$16 sps:$4 sm:$0xff]   ;;  %p5886_p12 = pnand %p5885_p11, %p6045_p5 }
  0x1e   : > { %1615 = vmatpush1.bf16.msra.mxu0 %v5182_v10  ;;  %v5196_v20 = vld [vmem:[%s7636_s2 + $0x44] ss:$16 sps:$4 sm:$0xff]   ;;  %v5200_v22 = vld [vmem:[%s7636_s2 + $0x40] ss:$16 sps:$4 sm:$0xff]  }
  0x1f   : > { %1658 = vmatpush1.bf16.msra.mxu1 %v5183_v11  ;;  %1616 = vmatprep.subr.bf16.mxu0 %v5184_v12  ;;  %v5198_v21 = vld [vmem:[%s7636_s2 + $0x244] ss:$16 sps:$4 sm:$0xff]   ;;  %v5201_v23 = vld [vmem:[%s7636_s2 + $0x240] ss:$16 sps:$4 sm:$0xff]   ;;  %p5887_p13 = pneg %p5886_p12 }
  0x20   : > { %1659 = vmatprep.subr.bf16.mxu1 %v5186_v13  ;;  %v5202_v24 = vld [vmem:[%s7636_s2 + $0x24] ss:$16 sps:$4 sm:$0xff]   ;;  %v5206_v26 = vld [vmem:[%s7636_s2 + $0x20] ss:$16 sps:$4 sm:$0xff]  }
  0x21   : > { %v5204_v25 = vld [vmem:[%s7636_s2 + $0x224] ss:$16 sps:$4 sm:$0xff]   ;;  %v5207_v27 = vld [vmem:[%s7636_s2 + $0x220] ss:$16 sps:$4 sm:$0xff]  }
  0x22   : > { %1617 = vmatpush1.bf16.msra.mxu0 %v5188_v14  ;;  %v5208_v28 = vld [vmem:[%s7636_s2 + $0x4] ss:$16 sps:$4 sm:$0xff]   ;;  %v5212_v30 = vld [vmem:[%s7636_s2] ss:$16 sps:$4 sm:$0xff]  }
  0x23   : > { %1660 = vmatpush1.bf16.msra.mxu1 %v5189_v15  ;;  %1618 = vmatprep.subr.bf16.mxu0 %v5190_v16  ;;  %v5210_v29 = vld [vmem:[%s7636_s2 + $0x204] ss:$16 sps:$4 sm:$0xff]   ;;  %v5213_v31 = vld [vmem:[%s7636_s2 + $0x200] ss:$16 sps:$4 sm:$0xff]  }
  0x24   : > { %1661 = vmatprep.subr.bf16.mxu1 %v5192_v17  ;;  %v5214_v32 = vld [vmem:[%s7636_s2 + $0x1e4] ss:$16 sps:$4 sm:$0xff]   ;;  %v5218_v34 = vld [vmem:[%s7636_s2 + $0x1e0] ss:$16 sps:$4 sm:$0xff]   ;;  %v5273_v17 = vld [vmem:[%s7636_s2 + $0xec] ss:$16 sps:$4 sm:$0xff]  }
  0x25   : > { %v5216_v33 = vld [vmem:[%s7636_s2 + $0x3e4] ss:$16 sps:$4 sm:$0xff]   ;;  %v5219_v35 = vld [vmem:[%s7636_s2 + $0x3e0] ss:$16 sps:$4 sm:$0xff]  }
  0x26   : > { %1619 = vmatpush1.bf16.msra.mxu0 %v5194_v18  ;;  %v5220_v36 = vld [vmem:[%s7636_s2 + $0x1c4] ss:$16 sps:$4 sm:$0xff]   ;;  %v5224_v38 = vld [vmem:[%s7636_s2 + $0x1c0] ss:$16 sps:$4 sm:$0xff]  }
  0x27   : > { %1662 = vmatpush1.bf16.msra.mxu1 %v5195_v19  ;;  %1620 = vmatprep.subr.bf16.mxu0 %v5196_v20  ;;  %v5222_v37 = vld [vmem:[%s7636_s2 + $0x3c4] ss:$16 sps:$4 sm:$0xff]   ;;  %v5225_v39 = vld [vmem:[%s7636_s2 + $0x3c0] ss:$16 sps:$4 sm:$0xff]   ;;  %v400_v20 = vld [vmem:[%s6194_s15 + $0x68] sm:$0xff] }
  0x28   : > { %1663 = vmatprep.subr.bf16.mxu1 %v5198_v21  ;;  %v5226_v40 = vld [vmem:[%s7636_s2 + $0x1a4] ss:$16 sps:$4 sm:$0xff]   ;;  %v5230_v42 = vld [vmem:[%s7636_s2 + $0x1a0] ss:$16 sps:$4 sm:$0xff]   ;;  %v5946_v21 = vmov 0  }
  0x29   : > { %v5228_v41 = vld [vmem:[%s7636_s2 + $0x3a4] ss:$16 sps:$4 sm:$0xff]   ;;  %v5231_v43 = vld [vmem:[%s7636_s2 + $0x3a0] ss:$16 sps:$4 sm:$0xff]  }
  0x2a   : > { %1621 = vmatpush1.bf16.msra.mxu0 %v5200_v22  ;;  %v5232_v44 = vld [vmem:[%s7636_s2 + $0x184] ss:$16 sps:$4 sm:$0xff]   ;;  %v5236_v50 = vld [vmem:[%s7636_s2 + $0x180] ss:$16 sps:$4 sm:$0xff]  }
  0x2b   : > { %1664 = vmatpush1.bf16.msra.mxu1 %v5201_v23  ;;  %1622 = vmatprep.subr.bf16.mxu0 %v5202_v24  ;;  %v5234_v45 = vld [vmem:[%s7636_s2 + $0x384] ss:$16 sps:$4 sm:$0xff]   ;;  %v5237_v51 = vld [vmem:[%s7636_s2 + $0x380] ss:$16 sps:$4 sm:$0xff]   ;;  %v5271_v24 = vld [vmem:[%s7636_s2 + $0xe8] ss:$16 sps:$4 sm:$0xff]  }
  0x2c   : > { %1665 = vmatprep.subr.bf16.mxu1 %v5204_v25  ;;  %v395_v47 = vld [vmem:[%s6194_s15 + $0x40] sm:$0xff]  ;;  %v397_v49 = vld [vmem:[%s6194_s15 + $0x50] sm:$0xff] }
  0x2d   : > { %v5238_v52 = vld [vmem:[%s7636_s2 + $0x164] ss:$16 sps:$4 sm:$0xff]   ;;  %v6215_v53 = vpack.c.bf16 %v395_v47, %v388_v46  ;;  %v6217_v54 = vpack.c.bf16 %v397_v49, %v390_v48  ;;  %v5242_v56 = vld [vmem:[%s7636_s2 + $0x160] ss:$16 sps:$4 sm:$0xff]   ;;  %v5301_v47 = vld [vmem:[%s7636_s2 + $0x48] ss:$16 sps:$4 sm:$0xff]  }
  0x2e   : > { %1623 = vmatpush1.bf16.msra.mxu0 %v5206_v26  ;;  %v5240_v55 = vld [vmem:[%s7636_s2 + $0x364] ss:$16 sps:$4 sm:$0xff]   ;;  %v5243_v57 = vld [vmem:[%s7636_s2 + $0x360] ss:$16 sps:$4 sm:$0xff]   ;;  %v5279_v26 = vld [vmem:[%s7636_s2 + $0xcc] ss:$16 sps:$4 sm:$0xff]  }
  0x2f   : > { %1666 = vmatpush1.bf16.msra.mxu1 %v5207_v27  ;;  %1624 = vmatprep.subr.bf16.mxu0 %v5208_v28  ;;  %v5244_v58 = vld [vmem:[%s7636_s2 + $0x144] ss:$16 sps:$4 sm:$0xff]   ;;  %v5248_v60 = vld [vmem:[%s7636_s2 + $0x140] ss:$16 sps:$4 sm:$0xff]   ;;  %v5277_v28 = vld [vmem:[%s7636_s2 + $0xc8] ss:$16 sps:$4 sm:$0xff]  }
  0x30   : > { %1667 = vmatprep.subr.bf16.mxu1 %v5210_v29  ;;  %1642 = vmatprep.mubr.bf16.mxu0 %v6215_v53  ;;  %v5246_v59 = vld [vmem:[%s7636_s2 + $0x344] ss:$16 sps:$4 sm:$0xff]   ;;  %v5249_v61 = vld [vmem:[%s7636_s2 + $0x340] ss:$16 sps:$4 sm:$0xff]   ;;  %v5309_v49 = vld [vmem:[%s7636_s2 + $0x2c] ss:$16 sps:$4 sm:$0xff]  }
  0x31   : > { %1685 = vmatprep.mubr.bf16.mxu1 %v6217_v54  ;;  %v5250_v62 = vld [vmem:[%s7636_s2 + $0x124] ss:$16 sps:$4 sm:$0xff]   ;;  %v5254_v0 = vld [vmem:[%s7636_s2 + $0x120] ss:$16 sps:$4 sm:$0xff]  }
  0x32   : > { %1625 = vmatpush1.bf16.msra.mxu0 %v5212_v30  ;;  %v5252_v63 = vld [vmem:[%s7636_s2 + $0x324] ss:$16 sps:$4 sm:$0xff]   ;;  %v5255_v1 = vld [vmem:[%s7636_s2 + $0x320] ss:$16 sps:$4 sm:$0xff]   ;;  %v5285_v30 = vld [vmem:[%s7636_s2 + $0xac] ss:$16 sps:$4 sm:$0xff]  }
  0x33   : > { %1668 = vmatpush1.bf16.msra.mxu1 %v5213_v31  ;;  %1626 = vmatprep.subr.bf16.mxu0 %v5214_v32  ;;  %v5256_v2 = vld [vmem:[%s7636_s2 + $0x104] ss:$16 sps:$4 sm:$0xff]   ;;  %v5260_v4 = vld [vmem:[%s7636_s2 + $0x100] ss:$16 sps:$4 sm:$0xff]   ;;  %v5283_v32 = vld [vmem:[%s7636_s2 + $0xa8] ss:$16 sps:$4 sm:$0xff]  }
  0x34   : > { %1669 = vmatprep.subr.bf16.mxu1 %v5216_v33  ;;  %v5258_v3 = vld [vmem:[%s7636_s2 + $0x304] ss:$16 sps:$4 sm:$0xff]   ;;  %v5261_v5 = vld [vmem:[%s7636_s2 + $0x300] ss:$16 sps:$4 sm:$0xff]  }
  0x35   : > { %v387_v6 = vld [vmem:[%s6194_s15] sm:$0xff]  ;;  %v389_v8 = vld [vmem:[%s6194_s15 + $0x10] sm:$0xff] }
  0x36   : > { %1627 = vmatpush2.bf16.msra.mxu0 %v5218_v34  ;;  %v5264_v10 = vld [vmem:[%s7636_s2 + $0x4e4] ss:$16 sps:$4 sm:$0xff]   ;;  %v6276_v12 = vpack.c.bf16 %v394_v7, %v387_v6  ;;  %v6278_v13 = vpack.c.bf16 %v396_v9, %v389_v8  ;;  %v5262_v14 = vld [vmem:[%s7636_s2 + $0x4e0] ss:$16 sps:$4 sm:$0xff]   ;;  %v5291_v34 = vld [vmem:[%s7636_s2 + $0x8c] ss:$16 sps:$4 sm:$0xff]  }
  0x37   : > { %1670 = vmatpush2.bf16.msra.mxu1 %v5219_v35  ;;  %1628 = vmatprep.subr.bf16.mxu0 %v5220_v36  ;;  %v5267_v11 = vld [vmem:[%s7636_s2 + $0x604] ss:$16 sps:$4 sm:$0xff]   ;;  %v5265_v15 = vld [vmem:[%s7636_s2 + $0x600] ss:$16 sps:$4 sm:$0xff]   ;;  %v5289_v36 = vld [vmem:[%s7636_s2 + $0x88] ss:$16 sps:$4 sm:$0xff]  }
  0x38   : > { %1671 = vmatprep.subr.bf16.mxu1 %v5222_v37  ;;  %v5270_v16 = vld [vmem:[%s7636_s2 + $0x4c4] ss:$16 sps:$4 sm:$0xff]   ;;  %v5268_v18 = vld [vmem:[%s7636_s2 + $0x4c0] ss:$16 sps:$4 sm:$0xff]   ;;  %v5339_v6 = vld [vmem:[%s7636_s2 + $0x18c] ss:$16 sps:$4 sm:$0xff]  }
  0x39   : > { %v393_v19 = vld [vmem:[%s6194_s15 + $0x30] sm:$0xff]  ;;  %v5337_v8 = vld [vmem:[%s7636_s2 + $0x188] ss:$16 sps:$4 sm:$0xff]  }
  0x3a   : > { %1629 = vmatpush2.bf16.msra.mxu0 %v5224_v38  ;;  %v5276_v22 = vld [vmem:[%s7636_s2 + $0x4a4] ss:$16 sps:$4 sm:$0xff]   ;;  %v6303_v23 = vpack.c.bf16 %v400_v20, %v393_v19  ;;  %v5274_v25 = vld [vmem:[%s7636_s2 + $0x4a0] ss:$16 sps:$4 sm:$0xff]   ;;  %v5297_v38 = vld [vmem:[%s7636_s2 + $0x6c] ss:$16 sps:$4 sm:$0xff]  }
  0x3b   : > { %1672 = vmatpush2.bf16.msra.mxu1 %v5225_v39  ;;  %1630 = vmatprep.subr.bf16.mxu0 %v5226_v40  ;;  %v5282_v27 = vld [vmem:[%s7636_s2 + $0x484] ss:$16 sps:$4 sm:$0xff]   ;;  %v5280_v29 = vld [vmem:[%s7636_s2 + $0x480] ss:$16 sps:$4 sm:$0xff]   ;;  %v5295_v40 = vld [vmem:[%s7636_s2 + $0x68] ss:$16 sps:$4 sm:$0xff]  }
  0x3c   : > { %1673 = vmatprep.subr.bf16.mxu1 %v5228_v41  ;;  %v5288_v31 = vld [vmem:[%s7636_s2 + $0x464] ss:$16 sps:$4 sm:$0xff]   ;;  %v5286_v33 = vld [vmem:[%s7636_s2 + $0x460] ss:$16 sps:$4 sm:$0xff]   ;;  %v392_v41 = vld [vmem:[%s6194_s15 + $0x28] sm:$0xff] }
  0x3d   : > { %v5294_v35 = vld [vmem:[%s7636_s2 + $0x444] ss:$16 sps:$4 sm:$0xff]   ;;  %v5292_v37 = vld [vmem:[%s7636_s2 + $0x440] ss:$16 sps:$4 sm:$0xff]  }
  0x3e   : > { %1631 = vmatpush2.bf16.msra.mxu0 %v5230_v42  ;;  %v5300_v39 = vld [vmem:[%s7636_s2 + $0x424] ss:$16 sps:$4 sm:$0xff]   ;;  %v5304_v48 = vld [vmem:[%s7636_s2 + $0x400] ss:$16 sps:$4 sm:$0xff]  }
  0x3f   : > { %1674 = vmatpush2.bf16.msra.mxu1 %v5231_v43  ;;  %1632 = vmatprep.subr.bf16.mxu0 %v5232_v44  ;;  %v399_v42 = vld [vmem:[%s6194_s15 + $0x60] sm:$0xff] }
  0x40   : > { %1675 = vmatprep.subr.bf16.mxu1 %v5234_v45  ;;  %v5298_v43 = vld [vmem:[%s7636_s2 + $0x420] ss:$16 sps:$4 sm:$0xff]   ;;  %v6364_v44 = vpack.c.bf16 %v399_v42, %v392_v41  ;;  %v5303_v45 = vld [vmem:[%s7636_s2 + $0x4c] ss:$16 sps:$4 sm:$0xff]   ;;  %v5306_v46 = vld [vmem:[%s7636_s2 + $0x404] ss:$16 sps:$4 sm:$0xff]  }
  0x41   : > { %v5342_v7 = vld [vmem:[%s7636_s2 + $0x544] ss:$16 sps:$4 sm:$0xff]   ;;  %v5340_v9 = vld [vmem:[%s7636_s2 + $0x540] ss:$16 sps:$4 sm:$0xff]   ;;  %v5384_v41 = vld [vmem:[%s7636_s2 + $0x26c] ss:$16 sps:$4 sm:$0xff]  }
  0x42   : > { %1633 = vmatpush2.bf16.msra.mxu0 %v5236_v50  ;;  %v5312_v50 = vld [vmem:[%s7636_s2 + $0x5e4] ss:$16 sps:$4 sm:$0xff]   ;;  %v5352_v19 = vld [vmem:[%s7636_s2 + $0x500] ss:$16 sps:$4 sm:$0xff]   ;;  %v5379_v42 = vld [vmem:[%s7636_s2 + $0x4a8] ss:$16 sps:$4 sm:$0xff]  }
  0x43   : > { %1676 = vmatpush2.bf16.msra.mxu1 %v5237_v51  ;;  %1634 = vmatprep.subr.bf16.mxu0 %v5238_v52  ;;  %v5307_v51 = vld [vmem:[%s7636_s2 + $0x28] ss:$16 sps:$4 sm:$0xff]   ;;  %v5310_v52 = vld [vmem:[%s7636_s2 + $0x5e0] ss:$16 sps:$4 sm:$0xff]  }
  0x44   : > { %1677 = vmatprep.subr.bf16.mxu1 %v5240_v55  ;;  %v5318_v55 = vld [vmem:[%s7636_s2 + $0x5c4] ss:$16 sps:$4 sm:$0xff]  }
  0x45   : > { %v391_v20 = vld [vmem:[%s6194_s15 + $0x20] sm:$0xff] }
  0x46   : > { %1635 = vmatpush2.bf16.msra.mxu0 %v5242_v56  ;;  %v5313_v56 = vld [vmem:[%s7636_s2 + $0x8] ss:$16 sps:$4 sm:$0xff]  }
  0x47   : > { %1678 = vmatpush2.bf16.msra.mxu1 %v5243_v57  ;;  %1636 = vmatprep.subr.bf16.mxu0 %v5244_v58  ;;  %v5316_v57 = vld [vmem:[%s7636_s2 + $0x5c0] ss:$16 sps:$4 sm:$0xff]   ;;  %v5321_v58 = vld [vmem:[%s7636_s2 + $0x1ec] ss:$16 sps:$4 sm:$0xff]  }
  0x48   : > { %1679 = vmatprep.subr.bf16.mxu1 %v5246_v59  ;;  %v5324_v59 = vld [vmem:[%s7636_s2 + $0x5a4] ss:$16 sps:$4 sm:$0xff]  }
  0x4a   : > { %1637 = vmatpush2.bf16.msra.mxu0 %v5248_v60  ;;  %v5319_v60 = vld [vmem:[%s7636_s2 + $0x1e8] ss:$16 sps:$4 sm:$0xff]  }
  0x4b   : > { %1680 = vmatpush2.bf16.msra.mxu1 %v5249_v61  ;;  %1638 = vmatprep.subr.bf16.mxu0 %v5250_v62  ;;  %v5322_v61 = vld [vmem:[%s7636_s2 + $0x5a0] ss:$16 sps:$4 sm:$0xff]   ;;  %v5327_v62 = vld [vmem:[%s7636_s2 + $0x1cc] ss:$16 sps:$4 sm:$0xff]  }
  0x4c   : > { %1681 = vmatprep.subr.bf16.mxu1 %v5252_v63  ;;  %v5330_v63 = vld [vmem:[%s7636_s2 + $0x584] ss:$16 sps:$4 sm:$0xff]  }
  0x4e   : > { %1639 = vmatpush2.bf16.msra.mxu0 %v5254_v0  ;;  %v5325_v0 = vld [vmem:[%s7636_s2 + $0x1c8] ss:$16 sps:$4 sm:$0xff]  }
  0x4f   : > { %1682 = vmatpush2.bf16.msra.mxu1 %v5255_v1  ;;  %1640 = vmatprep.subr.bf16.mxu0 %v5256_v2  ;;  %v5328_v1 = vld [vmem:[%s7636_s2 + $0x580] ss:$16 sps:$4 sm:$0xff]   ;;  %v5333_v2 = vld [vmem:[%s7636_s2 + $0x1ac] ss:$16 sps:$4 sm:$0xff]  }
  0x50   : > { %1683 = vmatprep.subr.bf16.mxu1 %v5258_v3  ;;  %v5336_v3 = vld [vmem:[%s7636_s2 + $0x564] ss:$16 sps:$4 sm:$0xff]  }
  0x52   : > { %1641 = vmatpush2.bf16.msra.mxu0 %v5260_v4  ;;  %v5331_v4 = vld [vmem:[%s7636_s2 + $0x1a8] ss:$16 sps:$4 sm:$0xff]  }
  0x53   : > { %1684 = vmatpush2.bf16.msra.mxu1 %v5261_v5  ;;  %1696 = vmatprep.subr.bf16.mxu0 %v5264_v10  ;;  %v5334_v5 = vld [vmem:[%s7636_s2 + $0x560] ss:$16 sps:$4 sm:$0xff]   ;;  %v5345_v10 = vld [vmem:[%s7636_s2 + $0x16c] ss:$16 sps:$4 sm:$0xff]  }
  0x54   : > { %1753 = vmatprep.subr.bf16.mxu1 %v5267_v11  ;;  %v5348_v11 = vld [vmem:[%s7636_s2 + $0x524] ss:$16 sps:$4 sm:$0xff]  }
  0x55   : > { %1643 = vmatmul.mubr.bf16.vlgmr.msra.gmra.mxu0 %v6276_v12 }
  0x56   : > { %1686 = vmatmul.mubr.bf16.vlgmr.msra.gmra.mxu1 %v6278_v13  ;;  %1697 = vmatpush1.bf16.msra.mxu0 %v5262_v14  ;;  %v5343_v14 = vld [vmem:[%s7636_s2 + $0x168] ss:$16 sps:$4 sm:$0xff]  }
  0x57   : > { %1754 = vmatpush1.bf16.msra.mxu1 %v5265_v15  ;;  %1698 = vmatprep.subr.bf16.mxu0 %v5270_v16  ;;  %v5346_v15 = vld [vmem:[%s7636_s2 + $0x520] ss:$16 sps:$4 sm:$0xff]   ;;  %v5351_v16 = vld [vmem:[%s7636_s2 + $0x14c] ss:$16 sps:$4 sm:$0xff]  }
  0x58   : > { %1771 = vmatprep.mubr.bf16.mxu1 %v5946_v21  ;;  %1782 = vmatprep.subr.bf16.mxu1 %v5273_v17  ;;  %v5354_v17 = vld [vmem:[%s7636_s2 + $0x504] ss:$16 sps:$4 sm:$0xff]  }
  0x59   : > { %1728 = vmatprep.mubr.bf16.mxu0 %v6364_v44 }
  0x5a   : > { %1699 = vmatpush1.bf16.msra.mxu0 %v5268_v18  ;;  %v5349_v18 = vld [vmem:[%s7636_s2 + $0x148] ss:$16 sps:$4 sm:$0xff]  }
  0x5b   : > { %1700 = vmatprep.subr.bf16.mxu0 %v5276_v22  ;;  %v398_v22 = vld [vmem:[%s6194_s15 + $0x58] sm:$0xff]  ;;  %s5890_s15 = scalar_lea.vmem %s5889_s21, 1792 }
  0x5c   : > { %p5892_p1 = scmp.lt.s32.totalorder %s5890_s15, %s5884_s17 }
  0x5e   : > { %4727 = vmatmul.mubr.msk.bf16.vlgmr.msra.gmra.mxu1 %vm1606_vm0, %v6303_v23  ;;  %1701 = vmatpush1.bf16.msra.mxu0 %v5274_v25  ;;  %v5360_v25 = vld [vmem:[%s7636_s2 + $0x2ec] ss:$16 sps:$4 sm:$0xff]   ;;  %p5893_p2 = por %p5892_p1, %p5891_p0 }
  0x5f   : > { %1783 = vmatpush1.bf16.msra.mxu1 %v5271_v24  ;;  %1702 = vmatprep.subr.bf16.mxu0 %v5282_v27  ;;  %v5357_v24 = vld [vmem:[%s7636_s2 + $0x12c] ss:$16 sps:$4 sm:$0xff]   ;;  %v5355_v27 = vld [vmem:[%s7636_s2 + $0x128] ss:$16 sps:$4 sm:$0xff]  }
  0x60   : > { %1784 = vmatprep.subr.bf16.mxu1 %v5279_v26  ;;  %1814 = vmatprep.mubr.bf16.mxu1 %v6215_v53  ;;  %v5315_v53 = vld [vmem:[%s7636_s2 + $0xc] ss:$16 sps:$4 sm:$0xff]   ;;  %v6483_v26 = vpack.c.bf16 %v398_v22, %v391_v20  ;;  %v5439_v20 = vld [vmem:[%s7636_s2 + $0x568] ss:$16 sps:$4 sm:$0xff]   ;;  %p5894_p3 = pnand %p5893_p2, %p5887_p13 }
  0x61   : > { %v5442_v22 = vld [vmem:[%s7636_s2 + $0x328] ss:$16 sps:$4 sm:$0xff]  }
  0x62   : > { %1703 = vmatpush1.bf16.msra.mxu0 %v5280_v29  ;;  %v5363_v29 = vld [vmem:[%s7636_s2 + $0x10c] ss:$16 sps:$4 sm:$0xff]  }
  0x63   : > { %1785 = vmatpush1.bf16.msra.mxu1 %v5277_v28  ;;  %1704 = vmatprep.subr.bf16.mxu0 %v5288_v31  ;;  %v5358_v28 = vld [vmem:[%s7636_s2 + $0x2e8] ss:$16 sps:$4 sm:$0xff]  }
  0x64   : > { %1786 = vmatprep.subr.bf16.mxu1 %v5285_v30  ;;  %v5366_v30 = vld [vmem:[%s7636_s2 + $0x2cc] ss:$16 sps:$4 sm:$0xff]   ;;  %v5361_v31 = vld [vmem:[%s7636_s2 + $0x108] ss:$16 sps:$4 sm:$0xff]  }
  0x66   : > { %1705 = vmatpush1.bf16.msra.mxu0 %v5286_v33  ;;  %v5369_v33 = vld [vmem:[%s7636_s2 + $0x4ec] ss:$16 sps:$4 sm:$0xff]  }
  0x67   : > { %1787 = vmatpush1.bf16.msra.mxu1 %v5283_v32  ;;  %1706 = vmatprep.subr.bf16.mxu0 %v5294_v35  ;;  %v5364_v32 = vld [vmem:[%s7636_s2 + $0x2c8] ss:$16 sps:$4 sm:$0xff]  }
  0x68   : > { %1788 = vmatprep.subr.bf16.mxu1 %v5291_v34  ;;  %v5372_v34 = vld [vmem:[%s7636_s2 + $0x2ac] ss:$16 sps:$4 sm:$0xff]   ;;  %v5367_v35 = vld [vmem:[%s7636_s2 + $0x4e8] ss:$16 sps:$4 sm:$0xff]  }
  0x6a   : > { %1707 = vmatpush1.bf16.msra.mxu0 %v5292_v37  ;;  %v5375_v37 = vld [vmem:[%s7636_s2 + $0x4cc] ss:$16 sps:$4 sm:$0xff]  }
  0x6b   : > { %1789 = vmatpush1.bf16.msra.mxu1 %v5289_v36  ;;  %1708 = vmatprep.subr.bf16.mxu0 %v5300_v39  ;;  %v5370_v36 = vld [vmem:[%s7636_s2 + $0x2a8] ss:$16 sps:$4 sm:$0xff]  }
  0x6c   : > { %1790 = vmatprep.subr.bf16.mxu1 %v5297_v38  ;;  %v5378_v38 = vld [vmem:[%s7636_s2 + $0x28c] ss:$16 sps:$4 sm:$0xff]   ;;  %v5373_v39 = vld [vmem:[%s7636_s2 + $0x4c8] ss:$16 sps:$4 sm:$0xff]  }
  0x6e   : > { %1709 = vmatpush1.bf16.msra.mxu0 %v5298_v43  ;;  %v5387_v43 = vld [vmem:[%s7636_s2 + $0x48c] ss:$16 sps:$4 sm:$0xff]  }
  0x6f   : > { %1791 = vmatpush1.bf16.msra.mxu1 %v5295_v40  ;;  %1710 = vmatprep.subr.bf16.mxu0 %v5306_v46  ;;  %v5381_v40 = vld [vmem:[%s7636_s2 + $0x4ac] ss:$16 sps:$4 sm:$0xff]   ;;  %v5385_v46 = vld [vmem:[%s7636_s2 + $0x488] ss:$16 sps:$4 sm:$0xff]  }
  0x70   : > { %1792 = vmatprep.subr.bf16.mxu1 %v5303_v45  ;;  %v5390_v45 = vld [vmem:[%s7636_s2 + $0x24c] ss:$16 sps:$4 sm:$0xff]  }
  0x72   : > { %1711 = vmatpush1.bf16.msra.mxu0 %v5304_v48  ;;  %v5396_v48 = vld [vmem:[%s7636_s2 + $0x22c] ss:$16 sps:$4 sm:$0xff]  }
  0x73   : > { %1793 = vmatpush1.bf16.msra.mxu1 %v5301_v47  ;;  %1712 = vmatprep.subr.bf16.mxu0 %v5312_v50  ;;  %v5393_v47 = vld [vmem:[%s7636_s2 + $0x46c] ss:$16 sps:$4 sm:$0xff]   ;;  %v5394_v50 = vld [vmem:[%s7636_s2 + $0x228] ss:$16 sps:$4 sm:$0xff]  }
  0x74   : > { %1794 = vmatprep.subr.bf16.mxu1 %v5309_v49  ;;  %v5391_v49 = vld [vmem:[%s7636_s2 + $0x468] ss:$16 sps:$4 sm:$0xff]  }
  0x76   : > { %1713 = vmatpush2.bf16.msra.mxu0 %v5310_v52  ;;  %v5402_v52 = vld [vmem:[%s7636_s2 + $0x20c] ss:$16 sps:$4 sm:$0xff]  }
  0x77   : > { %1795 = vmatpush1.bf16.msra.mxu1 %v5307_v51  ;;  %1714 = vmatprep.subr.bf16.mxu0 %v5318_v55  ;;  %v5399_v51 = vld [vmem:[%s7636_s2 + $0x44c] ss:$16 sps:$4 sm:$0xff]   ;;  %v5400_v55 = vld [vmem:[%s7636_s2 + $0x208] ss:$16 sps:$4 sm:$0xff]  }
  0x78   : > { %1796 = vmatprep.subr.bf16.mxu1 %v5315_v53  ;;  %v5397_v53 = vld [vmem:[%s7636_s2 + $0x448] ss:$16 sps:$4 sm:$0xff]  }
  0x7a   : > { %1715 = vmatpush2.bf16.msra.mxu0 %v5316_v57  ;;  %v5408_v57 = vld [vmem:[%s7636_s2 + $0x3ec] ss:$16 sps:$4 sm:$0xff]  }
  0x7b   : > { %1797 = vmatpush1.bf16.msra.mxu1 %v5313_v56  ;;  %1716 = vmatprep.subr.bf16.mxu0 %v5324_v59  ;;  %v5405_v56 = vld [vmem:[%s7636_s2 + $0x42c] ss:$16 sps:$4 sm:$0xff]   ;;  %v5406_v59 = vld [vmem:[%s7636_s2 + $0x3e8] ss:$16 sps:$4 sm:$0xff]  }
  0x7c   : > { %1798 = vmatprep.subr.bf16.mxu1 %v5321_v58  ;;  %v5403_v58 = vld [vmem:[%s7636_s2 + $0x428] ss:$16 sps:$4 sm:$0xff]  }
  0x7e   : > { %1717 = vmatpush2.bf16.msra.mxu0 %v5322_v61  ;;  %v5414_v61 = vld [vmem:[%s7636_s2 + $0x3cc] ss:$16 sps:$4 sm:$0xff]  }
  0x7f   : > { %1799 = vmatpush2.bf16.msra.mxu1 %v5319_v60  ;;  %1718 = vmatprep.subr.bf16.mxu0 %v5330_v63  ;;  %v5411_v60 = vld [vmem:[%s7636_s2 + $0x40c] ss:$16 sps:$4 sm:$0xff]   ;;  %v5412_v63 = vld [vmem:[%s7636_s2 + $0x3c8] ss:$16 sps:$4 sm:$0xff]  }
  0x80   : > { %1800 = vmatprep.subr.bf16.mxu1 %v5327_v62  ;;  %v5409_v62 = vld [vmem:[%s7636_s2 + $0x408] ss:$16 sps:$4 sm:$0xff]  }
  0x82   : > { %1719 = vmatpush2.bf16.msra.mxu0 %v5328_v1  ;;  %v5420_v1 = vld [vmem:[%s7636_s2 + $0x3ac] ss:$16 sps:$4 sm:$0xff]  }
  0x83   : > { %1801 = vmatpush2.bf16.msra.mxu1 %v5325_v0  ;;  %1720 = vmatprep.subr.bf16.mxu0 %v5336_v3  ;;  %v5417_v0 = vld [vmem:[%s7636_s2 + $0x5ec] ss:$16 sps:$4 sm:$0xff]   ;;  %v5418_v3 = vld [vmem:[%s7636_s2 + $0x3a8] ss:$16 sps:$4 sm:$0xff]  }
  0x84   : > { %1802 = vmatprep.subr.bf16.mxu1 %v5333_v2  ;;  %v5415_v2 = vld [vmem:[%s7636_s2 + $0x5e8] ss:$16 sps:$4 sm:$0xff]  }
  0x86   : > { %1721 = vmatpush2.bf16.msra.mxu0 %v5334_v5  ;;  %v5426_v5 = vld [vmem:[%s7636_s2 + $0x38c] ss:$16 sps:$4 sm:$0xff]  }
  0x87   : > { %1803 = vmatpush2.bf16.msra.mxu1 %v5331_v4  ;;  %1722 = vmatprep.subr.bf16.mxu0 %v5342_v7  ;;  %v5423_v4 = vld [vmem:[%s7636_s2 + $0x5cc] ss:$16 sps:$4 sm:$0xff]   ;;  %v5424_v7 = vld [vmem:[%s7636_s2 + $0x388] ss:$16 sps:$4 sm:$0xff]  }
  0x88   : > { %1804 = vmatprep.subr.bf16.mxu1 %v5339_v6  ;;  %v5421_v6 = vld [vmem:[%s7636_s2 + $0x5c8] ss:$16 sps:$4 sm:$0xff]  }
  0x8a   : > { %1723 = vmatpush2.bf16.msra.mxu0 %v5340_v9  ;;  %v5432_v9 = vld [vmem:[%s7636_s2 + $0x36c] ss:$16 sps:$4 sm:$0xff]  }
  0x8b   : > { %1805 = vmatpush2.bf16.msra.mxu1 %v5337_v8  ;;  %1724 = vmatprep.subr.bf16.mxu0 %v5348_v11  ;;  %v5429_v8 = vld [vmem:[%s7636_s2 + $0x5ac] ss:$16 sps:$4 sm:$0xff]   ;;  %v5430_v11 = vld [vmem:[%s7636_s2 + $0x368] ss:$16 sps:$4 sm:$0xff]  }
  0x8c   : > { %1806 = vmatprep.subr.bf16.mxu1 %v5345_v10  ;;  %v5427_v10 = vld [vmem:[%s7636_s2 + $0x5a8] ss:$16 sps:$4 sm:$0xff]  }
  0x8e   : > { %1725 = vmatpush2.bf16.msra.mxu0 %v5346_v15  ;;  %v5438_v15 = vld [vmem:[%s7636_s2 + $0x34c] ss:$16 sps:$4 sm:$0xff]  }
  0x8f   : > { %1807 = vmatpush2.bf16.msra.mxu1 %v5343_v14  ;;  %1726 = vmatprep.subr.bf16.mxu0 %v5354_v17  ;;  %v5435_v14 = vld [vmem:[%s7636_s2 + $0x58c] ss:$16 sps:$4 sm:$0xff]   ;;  %v5436_v17 = vld [vmem:[%s7636_s2 + $0x348] ss:$16 sps:$4 sm:$0xff]  }
  0x90   : > { %1808 = vmatprep.subr.bf16.mxu1 %v5351_v16  ;;  %v5433_v16 = vld [vmem:[%s7636_s2 + $0x588] ss:$16 sps:$4 sm:$0xff]  }
  0x92   : > { %1727 = vmatpush2.bf16.msra.mxu0 %v5352_v19  ;;  %v5444_v19 = vld [vmem:[%s7636_s2 + $0x32c] ss:$16 sps:$4 sm:$0xff]  }
  0x93   : > { %1809 = vmatpush2.bf16.msra.mxu1 %v5349_v18  ;;  %1825 = vmatprep.subr.bf16.mxu0 %v5360_v25  ;;  %v5441_v18 = vld [vmem:[%s7636_s2 + $0x56c] ss:$16 sps:$4 sm:$0xff]  }
  0x94   : > { %1810 = vmatprep.subr.bf16.mxu1 %v5357_v24  ;;  %v5447_v24 = vld [vmem:[%s7636_s2 + $0x54c] ss:$16 sps:$4 sm:$0xff]  }
  0x95   : > { %1729 = vmatmul.mubr.bf16.vlgmr.msra.gmra.mxu0 %v6483_v26  ;;  %v5450_v25 = vld [vmem:[%s7636_s2 + $0x30c] ss:$16 sps:$4 sm:$0xff]  }
  0x96   : > { %1826 = vmatpush1.bf16.msra.mxu0 %v5358_v28  ;;  %1857 = vmatprep.mubr.bf16.mxu0 %v6217_v54  ;;  %v5376_v54 = vld [vmem:[%s7636_s2 + $0x288] ss:$16 sps:$4 sm:$0xff]  }
  0x97   : > { %1811 = vmatpush2.bf16.msra.mxu1 %v5355_v27  ;;  %1827 = vmatprep.subr.bf16.mxu0 %v5366_v30  ;;  %v5445_v27 = vld [vmem:[%s7636_s2 + $0x548] ss:$16 sps:$4 sm:$0xff]   ;;  %v5456_v30 = vld [vmem:[%s7636_s2 + $0x60c] ss:$16 sps:$4 sm:$0xff]  }
  0x98   : > { %1812 = vmatprep.subr.bf16.mxu1 %v5363_v29  ;;  %v5448_v28 = vld [vmem:[%s7636_s2 + $0x308] ss:$16 sps:$4 sm:$0xff]   ;;  %v5453_v29 = vld [vmem:[%s7636_s2 + $0x52c] ss:$16 sps:$4 sm:$0xff]  }
  0x9a   : > { %1828 = vmatpush1.bf16.msra.mxu0 %v5364_v32  ;;  %v5454_v32 = vld [vmem:[%s7636_s2 + $0x608] ss:$16 sps:$4 sm:$0xff]  }
  0x9b   : > { %1813 = vmatpush2.bf16.msra.mxu1 %v5361_v31  ;;  %1829 = vmatprep.subr.bf16.mxu0 %v5372_v34  ;;  %v5451_v31 = vld [vmem:[%s7636_s2 + $0x528] ss:$16 sps:$4 sm:$0xff]  }
  0x9c   : > { %1868 = vmatprep.subr.bf16.mxu1 %v5369_v33  ;;  %v5459_v33 = vld [vmem:[%s7636_s2 + $0x50c] ss:$16 sps:$4 sm:$0xff]  }
  0x9d   : > { %v5460_v34 = vld [vmem:[%s7638_s4 + $0x78] sm:$0xff]  }
  0x9e   : > { %1815 = vmatmul.mubr.bf16.vlgmr.msra.gmra.mxu1 %v6276_v12  ;;  %1830 = vmatpush1.bf16.msra.mxu0 %v5370_v36  ;;  %v5382_v12 = vld [vmem:[%s7636_s2 + $0x268] ss:$16 sps:$4 sm:$0xff]  }
  0x9f   : > { %1869 = vmatpush1.bf16.msra.mxu1 %v5367_v35  ;;  %1831 = vmatprep.subr.bf16.mxu0 %v5378_v38  ;;  %v5457_v35 = vld [vmem:[%s7636_s2 + $0x508] ss:$16 sps:$4 sm:$0xff]  }
  0xa0   : > { %1870 = vmatprep.subr.bf16.mxu1 %v5375_v37  ;;  %1900 = vmatprep.mubr.bf16.mxu1 %v6364_v44  ;;  %v5388_v44 = vld [vmem:[%s7636_s2 + $0x248] ss:$16 sps:$4 sm:$0xff]   ;;  %v5462_v37 = vld [vmem:[%s7638_s4 + $0x70] sm:$0xff]  }
  0xa1   : > { %v5461_v36 = vld [vmem:[%s7638_s4 + $0x38] sm:$0xff]   ;;  %v5464_v38 = vld [vmem:[%s7638_s4 + $0x68] sm:$0xff]  }
  0xa2   : > { %1832 = vmatpush1.bf16.msra.mxu0 %v5376_v54  ;;  %v5466_v54 = vld [vmem:[%s7638_s4 + $0x60] sm:$0xff]  }
  0xa3   : > { %1871 = vmatpush1.bf16.msra.mxu1 %v5373_v39  ;;  %1833 = vmatprep.subr.bf16.mxu0 %v5384_v41  ;;  %v5465_v39 = vld [vmem:[%s7638_s4 + $0x28] sm:$0xff]   ;;  %v5478_v41 = vld [vmem:[%s7638_s4 + $0xf0] sm:$0xff]  }
  0xa4   : > { %1872 = vmatprep.subr.bf16.mxu1 %v5381_v40  ;;  %v5477_v40 = vld [vmem:[%s7638_s4 + $0xb8] sm:$0xff]  }
  0xa6   : > { %1834 = vmatpush1.bf16.msra.mxu0 %v5382_v12  ;;  %v5479_v12 = vld [vmem:[%s7638_s4 + $0xb0] sm:$0xff]  }
  0xa7   : > { %1873 = vmatpush1.bf16.msra.mxu1 %v5379_v42  ;;  %1835 = vmatprep.subr.bf16.mxu0 %v5390_v45  ;;  %v5468_v42 = vld [vmem:[%s7638_s4 + $0x58] sm:$0xff]  }
  0xa8   : > { %1874 = vmatprep.subr.bf16.mxu1 %v5387_v43  ;;  %v5480_v43 = vld [vmem:[%s7638_s4 + $0xe8] sm:$0xff]   ;;  %v5469_v45 = vld [vmem:[%s7638_s4 + $0x18] sm:$0xff]  }
  0xaa   : > { %1836 = vmatpush1.bf16.msra.mxu0 %v5388_v44  ;;  %v5471_v44 = vld [vmem:[%s7638_s4 + $0x10] sm:$0xff]  }
  0xab   : > { %1875 = vmatpush1.bf16.msra.mxu1 %v5385_v46  ;;  %1837 = vmatprep.subr.bf16.mxu0 %v5396_v48  ;;  %v5470_v46 = vld [vmem:[%s7638_s4 + $0x50] sm:$0xff]   ;;  %v5473_v48 = vld [vmem:[%s7638_s4 + $0x8] sm:$0xff]  }
  0xac   : > { %1876 = vmatprep.subr.bf16.mxu1 %v5393_v47  ;;  %v5472_v47 = vld [vmem:[%s7638_s4 + $0x48] sm:$0xff]  }
  0xae   : > { %1838 = vmatpush1.bf16.msra.mxu0 %v5394_v50  ;;  %v5475_v50 = vld [vmem:[%s7638_s4] sm:$0xff]  }
  0xaf   : > { %1877 = vmatpush1.bf16.msra.mxu1 %v5391_v49  ;;  %1839 = vmatprep.subr.bf16.mxu0 %v5402_v52  ;;  %v5474_v49 = vld [vmem:[%s7638_s4 + $0x40] sm:$0xff]  }
  0xb0   : > { %1878 = vmatprep.subr.bf16.mxu1 %v5399_v51  ;;  %v5481_v51 = vld [vmem:[%s7638_s4 + $0xa8] sm:$0xff]   ;;  %v5482_v52 = vld [vmem:[%s7638_s4 + $0xe0] sm:$0xff]  }
  0xb2   : > { %1840 = vmatpush1.bf16.msra.mxu0 %v5400_v55  ;;  %v5484_v55 = vld [vmem:[%s7638_s4 + $0xd8] sm:$0xff]  }
  0xb3   : > { %1879 = vmatpush1.bf16.msra.mxu1 %v5397_v53  ;;  %1841 = vmatprep.subr.bf16.mxu0 %v5408_v57  ;;  %v5483_v53 = vld [vmem:[%s7638_s4 + $0xa0] sm:$0xff]   ;;  %v5486_v57 = vld [vmem:[%s7638_s4 + $0xd0] sm:$0xff]  }
  0xb4   : > { %1880 = vmatprep.subr.bf16.mxu1 %v5405_v56  ;;  %v5485_v56 = vld [vmem:[%s7638_s4 + $0x98] sm:$0xff]  }
  0xb6   : > { %1842 = vmatpush2.bf16.msra.mxu0 %v5406_v59  ;;  %v5488_v59 = vld [vmem:[%s7638_s4 + $0xc8] sm:$0xff]  }
  0xb7   : > { %1881 = vmatpush1.bf16.msra.mxu1 %v5403_v58  ;;  %1843 = vmatprep.subr.bf16.mxu0 %v5414_v61  ;;  %v5487_v58 = vld [vmem:[%s7638_s4 + $0x90] sm:$0xff]   ;;  %v5490_v61 = vld [vmem:[%s7638_s4 + $0xc0] sm:$0xff]  }
  0xb8   : > { %1882 = vmatprep.subr.bf16.mxu1 %v5411_v60  ;;  %v5489_v60 = vld [vmem:[%s7638_s4 + $0x88] sm:$0xff]  }
  0xba   : > { %1844 = vmatpush2.bf16.msra.mxu0 %v5412_v63  ;;  %v2317_v63 = vld [vmem:[%s383_s20] sm:$0xff] }
  0xbb   : > { %1883 = vmatpush1.bf16.msra.mxu1 %v5409_v62  ;;  %1845 = vmatprep.subr.bf16.mxu0 %v5420_v1  ;;  %v5491_v62 = vld [vmem:[%s7638_s4 + $0x80] sm:$0xff]  }
  0xbc   : > { %1884 = vmatprep.subr.bf16.mxu1 %v5417_v0  ;;  %2321 = vrot.lane.b32.xlu0 %v2317_v63, %s5947_s22  ;;  %v2318_v0 = vld [vmem:[%s383_s20 + $0x8] sm:$0xff]  ;;  %s5948_s20 = smov 96  }
  0xbe   : > { %1846 = vmatpush2.bf16.msra.mxu0 %v5418_v3 }
  0xbf   : > { %1885 = vmatpush2.bf16.msra.mxu1 %v5415_v2  ;;  %1847 = vmatprep.subr.bf16.mxu0 %v5426_v5  ;;  %v606_v2 = vlaneseq }
  0xc0   : > { %1886 = vmatprep.subr.bf16.mxu1 %v5423_v4  ;;  %2323 = vrot.lane.b32.xlu0 %v2318_v0, %s5947_s22  ;;  %s7587_s22 = scalar_lea.hbm %s7644_s10, %s5121_s11 }
  0xc1   : > { %v6798_v4 = vshrl.u32 %v606_v2, 7 }
  0xc2   : > { %1848 = vmatpush2.bf16.msra.mxu0 %v5424_v7 }
  0xc3   : > { %1887 = vmatpush2.bf16.msra.mxu1 %v5421_v6  ;;  %1849 = vmatprep.subr.bf16.mxu0 %v5432_v9  ;;  %v6801_v7 = vsub.s32 1, %v6798_v4 }
  0xc4   : > { %1888 = vmatprep.subr.bf16.mxu1 %v5429_v8  ;;  %v6804_v8 = vsub.s32 0, %v6798_v4 }
  0xc6   : > { %1850 = vmatpush2.bf16.msra.mxu0 %v5430_v11 }
  0xc7   : > { %1889 = vmatpush2.bf16.msra.mxu1 %v5427_v10  ;;  %1851 = vmatprep.subr.bf16.mxu0 %v5438_v15  ;;  %v604_v10 = vld [vmem:[%s7637_s3] sm:$0xf] }
  0xc8   : > { %1890 = vmatprep.subr.bf16.mxu1 %v5435_v14  ;;  %v613_v14 = vrot.slane %v604_v10, %v6801_v7  ;;  %v609_v15 = vrot.slane %v604_v10, %v6804_v8 }
  0xca   : > { %1852 = vmatpush2.bf16.msra.mxu0 %v5436_v17 }
  0xcb   : > { %1891 = vmatpush2.bf16.msra.mxu1 %v5433_v16  ;;  %1853 = vmatprep.subr.bf16.mxu0 %v5444_v19 }
  0xcc   : > { %1892 = vmatprep.subr.bf16.mxu1 %v5441_v18 }
  0xce   : > { %1854 = vmatpush2.bf16.msra.mxu0 %v5442_v22 }
  0xcf   : > { %1893 = vmatpush2.bf16.msra.mxu1 %v5439_v20  ;;  %1855 = vmatprep.subr.bf16.mxu0 %v5450_v25 }
  0xd0   : > { %1894 = vmatprep.subr.bf16.mxu1 %v5447_v24 }
  0xd2   : > { %1856 = vmatpush2.bf16.msra.mxu0 %v5448_v28 }
  0xd3   : > { %1895 = vmatpush2.bf16.msra.mxu1 %v5445_v27  ;;  %1925 = vmatprep.subr.bf16.mxu0 %v5456_v30 }
  0xd4   : > { %1896 = vmatprep.subr.bf16.mxu1 %v5453_v29 }
  0xd5   : > { %1858 = vmatmul.mubr.bf16.vlgmr.msra.gmra.mxu0 %v6278_v13  ;;  %v5463_v13 = vld [vmem:[%s7638_s4 + $0x30] sm:$0xff]  }
  0xd6   : > { %1926 = vmatpush1.bf16.msra.mxu0 %v5454_v32  ;;  %1943 = vmatprep.mubr.bf16.mxu0 %v5946_v21 }
  0xd7   : > { %1897 = vmatpush2.bf16.msra.mxu1 %v5451_v31  ;;  %5031 = vmatprep.subr.bf16.mxu0 %v5460_v34 }
  0xd8   : > { %1898 = vmatprep.subr.bf16.mxu1 %v5459_v33 }
  0xdb   : > { %1899 = vmatpush2.bf16.msra.mxu1 %v5457_v35 }
  0xdd   : > { %4728 = vmatmul.mubr.msk.bf16.vlgmr.msra.gmra.mxu0 %vm1606_vm0, %v6303_v23  ;;  %v5467_v23 = vld [vmem:[%s7638_s4 + $0x20] sm:$0xff]  }
  0xde   : > { %1901 = vmatmul.mubr.bf16.vlgmr.msra.gmra.mxu1 %v6483_v26  ;;  %5032 = vmatpush3.bf16.msra.mxu0 %v5461_v36  ;;  %v5476_v26 = vld [vmem:[%s7638_s4 + $0xf8] sm:$0xff]  }
  0xdf   : > { %5033 = vmatprep.subr.bf16.mxu0 %v5462_v37  ;;  %5053 = vmatprep.subr.bf16.mxu1 %v5476_v26 }
  0xe0   : > { %5054 = vmatpush3.bf16.msra.mxu1 %v5477_v40 }
  0xe1   : > { %5055 = vmatprep.subr.bf16.mxu1 %v5478_v41 }
  0xe2   : > { %5034 = vmatpush3.bf16.msra.mxu0 %v5463_v13 }
  0xe3   : > { %5035 = vmatprep.subr.bf16.mxu0 %v5464_v38 }
  0xe4   : > { %5056 = vmatpush3.bf16.msra.mxu1 %v5479_v12 }
  0xe5   : > { %5057 = vmatprep.subr.bf16.mxu1 %v5480_v43 }
  0xe6   : > { %5036 = vmatpush3.bf16.msra.mxu0 %v5465_v39 }
  0xe7   : > { %5037 = vmatprep.subr.bf16.mxu0 %v5466_v54 }
  0xe8   : > { %5058 = vmatpush3.bf16.msra.mxu1 %v5481_v51 }
  0xe9   : > { %5059 = vmatprep.subr.bf16.mxu1 %v5482_v52 }
  0xea   : > { %5038 = vmatpush3.bf16.msra.mxu0 %v5467_v23 }
  0xeb   : > { %5039 = vmatprep.subr.bf16.mxu0 %v5468_v42 }
  0xec   : > { %5060 = vmatpush3.bf16.msra.mxu1 %v5483_v53 }
  0xed   : > { %5061 = vmatprep.subr.bf16.mxu1 %v5484_v55 }
  0xee   : > { %5040 = vmatpush3.bf16.msra.mxu0 %v5469_v45 }
  0xef   : > { %5041 = vmatprep.subr.bf16.mxu0 %v5470_v46 }
  0xf0   : > { %5062 = vmatpush3.bf16.msra.mxu1 %v5485_v56 }
  0xf1   : > { %5063 = vmatprep.subr.bf16.mxu1 %v5486_v57 }
  0xf2   : > { %5042 = vmatpush3.bf16.msra.mxu0 %v5471_v44 }
  0xf3   : > { %5043 = vmatprep.subr.bf16.mxu0 %v5472_v47 }
  0xf4   : > { %5064 = vmatpush3.bf16.msra.mxu1 %v5487_v58 }
  0xf5   : > { %5065 = vmatprep.subr.bf16.mxu1 %v5488_v59 }
  0xf6   : > { %5044 = vmatpush3.bf16.msra.mxu0 %v5473_v48  ;;  %v6813_v48 = vsub.s32 3, %v6798_v4 }
  0xf7   : > { %5045 = vmatprep.subr.bf16.mxu0 %v5474_v49  ;;  %v6816_v49 = vsub.s32 2, %v6798_v4 }
  0xf8   : > { %5066 = vmatpush3.bf16.msra.mxu1 %v5489_v60  ;;  %v621_v53 = vrot.slane %v604_v10, %v6813_v48 }
  0xf9   : > { %5067 = vmatprep.subr.bf16.mxu1 %v5490_v61  ;;  %v617_v55 = vrot.slane %v604_v10, %v6816_v49 }
  0xfa   : > { %5046 = vmatpush3.bf16.msra.mxu0 %v5475_v50 }
  0xfc   : > { %5068 = vmatpush3.bf16.msra.mxu1 %v5491_v62 }
 0x115   : > { %v1644_v5 = vpop.f32.mrf.mxu0 }
 0x116   : > { %v1687_v1 = vpop.f32.mrf.mxu1  ;;  %v1645_v19 = vadd.f32 %v1644_v5, %v609_v15 }
 0x117   : > { %v1646_v9 = vpop.f32.mrf.mxu0 }
 0x118   : > { %v1689_v3 = vpop.f32.mrf.mxu1  ;;  %v1647_v18 = vadd.f32 %v1646_v9, %v613_v14  ;;  %v1688_v29 = vadd.f32 %v1687_v1, %v1645_v19 }
 0x119   : > { %v1648_v16 = vpop.f32.mrf.mxu0 }
 0x11a   : > { %v1691_v6 = vpop.f32.mrf.mxu1  ;;  %v1649_v22 = vadd.f32 %v1648_v16, %v609_v15  ;;  %v1690_v27 = vadd.f32 %v1689_v3, %v1647_v18 }
 0x11b   : > { %v1650_v20 = vpop.f32.mrf.mxu0 }
 0x11c   : > { %v1693_v11 = vpop.f32.mrf.mxu1  ;;  %v1651_v28 = vadd.f32 %v1650_v20, %v613_v14  ;;  %v1692_v31 = vadd.f32 %v1691_v6, %v1649_v22 }
 0x11e   : > { %v1773_v17 = vpop.f32.mrf.mxu1  ;;  %v1694_v36 = vadd.f32 %v1693_v11, %v1651_v28 }
 0x120   : > { %v1775_v24 = vpop.f32.mrf.mxu1 }
 0x122   : > { %v1777_v33 = vpop.f32.mrf.mxu1 }
 0x124   : > { %v1779_v23 = vpop.f32.mrf.mxu1 }
 0x155   : > { %v1730_v25 = vpop.f32.mrf.mxu0 }
 0x156   : > { %v1731_v34 = vadd.f32 %v1730_v25, %v1688_v29 }
 0x157   : > { %v1732_v30 = vpop.f32.mrf.mxu0 }
 0x158   : > { %v1733_v32 = vadd.f32 %v1732_v30, %v1690_v27  ;;  %v1774_v26 = vadd.f32 %v1773_v17, %v1731_v34 }
 0x159   : > { %v1734_v35 = vpop.f32.mrf.mxu0 }
 0x15a   : > { %v1735_v37 = vadd.f32 %v1734_v35, %v1692_v31  ;;  %v1776_v38 = vadd.f32 %v1775_v24, %v1733_v32  ;;  %v1954_v43 = vmax.f32 %v1774_v26, 0.0 }
 0x15b   : > { %v1736_v13 = vpop.f32.mrf.mxu0 }
 0x15c   : > { %v1778_v39 = vadd.f32 %v1777_v33, %v1735_v37  ;;  %v1737_v54 = vadd.f32 %v1736_v13, %v1694_v36  ;;  %v1955_v42 = vmax.f32 %v1776_v38, 0.0  ;;  %v4729_v37 = vld [vmem:[%s7639_s5] ss:$0 sm:$0xff] }
 0x15e   : > { %v1780_v40 = vadd.f32 %v1779_v23, %v1737_v54  ;;  %v1958_v41 = vmax.f32 %v1778_v39, 0.0  ;;  %v1816_v44 = vpop.f32.mrf.mxu1 }
 0x15f   : > { %v1817_v60 = vadd.f32 %v1816_v44, %v617_v55 }
 0x160   : > { %v1959_v12 = vmax.f32 %v1780_v40, 0.0  ;;  %v1962_v46 = vpack.c.bf16 %v1958_v41, %v1954_v43  ;;  %v1818_v47 = vpop.f32.mrf.mxu1 }
 0x161   : > { %v1819_v59 = vadd.f32 %v1818_v47, %v621_v53  ;;  %v5494_v47 = vld [vmem:[%s7640_s6 + $0x24] ss:$16 sps:$4 sm:$0xff]  }
 0x162   : > { %v1963_v45 = vpack.c.bf16 %v1959_v12, %v1955_v42  ;;  %v1820_v51 = vpop.f32.mrf.mxu1  ;;  %2426 = vmatprep.subr.bf16.mxu0 %v5494_v47  ;;  %v5561_v47 = vld [vmem:[%s7642_s8 + $0x690] ss:$28 sps:$4 sm:$0xff]  }
 0x163   : > { %v1821_v63 = vadd.f32 %v1820_v51, %v617_v55  ;;  %v5500_v55 = vld [vmem:[%s7640_s6 + $0x4] ss:$16 sps:$4 sm:$0xff]  }
 0x164   : > { %2261 = vmatprep.mubr.bf16.mxu0 %v1963_v45  ;;  %v1822_v57 = vpop.f32.mrf.mxu1 }
 0x165   : > { %2262 = vmatmul.mubr.bf16.vlgmr.msra.gmra.mxu0 %v1962_v46  ;;  %v1823_v5 = vadd.f32 %v1822_v57, %v621_v53  ;;  %v5495_v53 = vld [vmem:[%s7640_s6 + $0x28] ss:$16 sps:$4 sm:$0xff]   ;;  %v5498_v57 = vld [vmem:[%s7640_s6] ss:$16 sps:$4 sm:$0xff]  }
 0x166   : > { %2446 = vmatprep.mubr.bf16.mxu0 %v5946_v21 }
 0x195   : > { %v1859_v50 = vpop.f32.mrf.mxu0 }
 0x196   : > { %v1860_v1 = vadd.f32 %v1859_v50, %v1817_v60  ;;  %v5497_v50 = vld [vmem:[%s7640_s6 + $0x2c] ss:$16 sps:$4 sm:$0xff]  }
 0x197   : > { %v1861_v52 = vpop.f32.mrf.mxu0  ;;  %2469 = vmatprep.subr.bf16.mxu1 %v5497_v50  ;;  %v5506_v60 = vld [vmem:[%s7642_s8 + $0x18c] ss:$28 sps:$4 sm:$0xff]   ;;  %v5566_v50 = vld [vmem:[%s7642_s8 + $0x2dc] ss:$28 sps:$4 sm:$0xff]  }
 0x198   : > { %v1862_v0 = vadd.f32 %v1861_v52, %v1819_v59  ;;  %v5492_v52 = vld [vmem:[%s7640_s6 + $0x20] ss:$16 sps:$4 sm:$0xff]   ;;  %v2322_v59 = vpop.permute.xlu0 %2321 }
 0x199   : > { %v1863_v56 = vpop.f32.mrf.mxu0  ;;  %2427 = vmatpush1.bf16.msra.mxu0 %v5492_v52  ;;  %v5564_v52 = vld [vmem:[%s7642_s8 + $0x2d8] ss:$28 sps:$4 sm:$0xff]  }
 0x19a   : > { %v1864_v6 = vadd.f32 %v1863_v56, %v1821_v63  ;;  %v5503_v56 = vld [vmem:[%s7640_s6 + $0xc] ss:$16 sps:$4 sm:$0xff]   ;;  %2428 = vmatprep.subr.bf16.mxu0 %v5500_v55  ;;  %v5572_v55 = vld [vmem:[%s7642_s8 + $0x2a4] ss:$28 sps:$4 sm:$0xff]  }
 0x19b   : > { %v1865_v58 = vpop.f32.mrf.mxu0 }
 0x19c   : > { %v1866_v16 = vadd.f32 %v1865_v58, %v1823_v5  ;;  %v5501_v58 = vld [vmem:[%s7640_s6 + $0x8] ss:$16 sps:$4 sm:$0xff]  }
 0x19d   : > { %v1945_v62 = vpop.f32.mrf.mxu0  ;;  %2429 = vmatpush1.bf16.msra.mxu0 %v5498_v57  ;;  %v5570_v57 = vld [vmem:[%s7642_s8 + $0x2a0] ss:$28 sps:$4 sm:$0xff]  }
 0x19e   : > { %v1902_v61 = vpop.f32.mrf.mxu1  ;;  %3957 = vmatprep.subr.bf16.mxu0 %v5506_v60  ;;  %v5581_v60 = vld [vmem:[%s7642_s8 + $0x5ec] ss:$28 sps:$4 sm:$0xff]  }
 0x19f   : > { %v1947_v3 = vpop.f32.mrf.mxu0  ;;  %v1903_v11 = vadd.f32 %v1902_v61, %v1860_v1  ;;  %v5509_v61 = vld [vmem:[%s7642_s8 + $0x50c] ss:$28 sps:$4 sm:$0xff]  }
 0x1a0   : > { %v1904_v2 = vpop.f32.mrf.mxu1 }
 0x1a1   : > { %v1905_v9 = vadd.f32 %v1904_v2, %v1862_v0  ;;  %v1949_v15 = vpop.f32.mrf.mxu0  ;;  %v1946_v24 = vadd.f32 %v1945_v62, %v1903_v11  ;;  %v2324_v0 = vpop.permute.xlu0 %2323  ;;  %v5504_v11 = vld [vmem:[%s7642_s8 + $0x188] ss:$28 sps:$4 sm:$0xff]  }
 0x1a2   : > { %v1906_v14 = vpop.f32.mrf.mxu1 }
 0x1a3   : > { %v1907_v10 = vadd.f32 %v1906_v14, %v1864_v6  ;;  %v1951_v18 = vpop.f32.mrf.mxu0  ;;  %v1948_v19 = vadd.f32 %v1947_v3, %v1905_v9  ;;  %v1956_v30 = vmax.f32 %v1946_v24, 0.0  ;;  %v5507_v14 = vld [vmem:[%s7642_s8 + $0x508] ss:$28 sps:$4 sm:$0xff]   ;;  %v5519_v24 = vld [vmem:[%s7642_s8 + $0x498] ss:$28 sps:$4 sm:$0xff]  }
 0x1a4   : > { %v1908_v17 = vpop.f32.mrf.mxu1 }
 0x1a5   : > { %v1950_v20 = vadd.f32 %v1949_v15, %v1907_v10  ;;  %v1909_v22 = vadd.f32 %v1908_v17, %v1866_v16  ;;  %v1957_v28 = vmax.f32 %v1948_v19, 0.0  ;;  %v5512_v16 = vld [vmem:[%s7642_s8 + $0x154] ss:$28 sps:$4 sm:$0xff]   ;;  %v5518_v19 = vld [vmem:[%s7642_s8 + $0x11c] ss:$28 sps:$4 sm:$0xff]  }
 0x1a6   : > { %v5515_v10 = vld [vmem:[%s7642_s8 + $0x4d4] ss:$28 sps:$4 sm:$0xff]  }
 0x1a7   : > { %v1952_v25 = vadd.f32 %v1951_v18, %v1909_v22  ;;  %v1960_v27 = vmax.f32 %v1950_v20, 0.0  ;;  %v5510_v17 = vld [vmem:[%s7642_s8 + $0x150] ss:$28 sps:$4 sm:$0xff]   ;;  %v5521_v20 = vld [vmem:[%s7642_s8 + $0x49c] ss:$28 sps:$4 sm:$0xff]  }
 0x1a8   : > { %v5513_v18 = vld [vmem:[%s7642_s8 + $0x4d0] ss:$28 sps:$4 sm:$0xff]   ;;  %v5516_v22 = vld [vmem:[%s7642_s8 + $0x118] ss:$28 sps:$4 sm:$0xff]  }
 0x1a9   : > { %v1961_v29 = vmax.f32 %v1952_v25, 0.0  ;;  %v1964_v32 = vpack.c.bf16 %v1960_v27, %v1956_v30  ;;  %v5524_v25 = vld [vmem:[%s7642_s8 + $0xe4] ss:$28 sps:$4 sm:$0xff]   ;;  %v5530_v30 = vld [vmem:[%s7642_s8 + $0xac] ss:$28 sps:$4 sm:$0xff]  }
 0x1aa   : > { %v5527_v27 = vld [vmem:[%s7642_s8 + $0x464] ss:$28 sps:$4 sm:$0xff]  }
 0x1ab   : > { %v1965_v31 = vpack.c.bf16 %v1961_v29, %v1957_v28  ;;  %v5522_v28 = vld [vmem:[%s7642_s8 + $0xe0] ss:$28 sps:$4 sm:$0xff]  }
 0x1ac   : > { %v5525_v29 = vld [vmem:[%s7642_s8 + $0x460] ss:$28 sps:$4 sm:$0xff]  }
 0x1ad   : > { %2302 = vmatprep.mubr.bf16.mxu1 %v1965_v31  ;;  %v5533_v31 = vld [vmem:[%s7642_s8 + $0x42c] ss:$28 sps:$4 sm:$0xff]  }
 0x1ae   : > { %2303 = vmatmul.mubr.bf16.vlgmr.msra.gmra.mxu1 %v1964_v32  ;;  %v5528_v32 = vld [vmem:[%s7642_s8 + $0xa8] ss:$28 sps:$4 sm:$0xff]  }
 0x1af   : > { %2489 = vmatprep.mubr.bf16.mxu1 %v5946_v21  ;;  %2470 = vmatpush1.bf16.msra.mxu1 %v5495_v53  ;;  %v5567_v53 = vld [vmem:[%s7642_s8 + $0x658] ss:$28 sps:$4 sm:$0xff]  }
 0x1b0   : > { %2471 = vmatprep.subr.bf16.mxu1 %v5503_v56  ;;  %v5575_v56 = vld [vmem:[%s7642_s8 + $0x624] ss:$28 sps:$4 sm:$0xff]  }
 0x1b3   : > { %2472 = vmatpush1.bf16.msra.mxu1 %v5501_v58  ;;  %v5573_v58 = vld [vmem:[%s7642_s8 + $0x620] ss:$28 sps:$4 sm:$0xff]  }
 0x1b4   : > { %4000 = vmatprep.subr.bf16.mxu1 %v5509_v61  ;;  %v5576_v61 = vld [vmem:[%s7642_s8 + $0x268] ss:$28 sps:$4 sm:$0xff]  }
 0x225   : > { %v5047_v33 = vpop.f32.mrf.mxu0 }
 0x227   : > { %v5048_v34 = vpop.f32.mrf.mxu0 }
 0x228   : > { %v5049_v36 = vadd.f32 %v5048_v34, %v5047_v33  ;;  %v5531_v33 = vld [vmem:[%s7642_s8 + $0x428] ss:$28 sps:$4 sm:$0xff]   ;;  %v5536_v34 = vld [vmem:[%s7642_s8 + $0x74] ss:$28 sps:$4 sm:$0xff]  }
 0x229   : > { %v5050_v35 = vpop.f32.mrf.mxu0 }
 0x22a   : > { %v2264_v54 = vadd.f32 %v5049_v36, %v4729_v37  ;;  %v5534_v36 = vld [vmem:[%s7642_s8 + $0x70] ss:$28 sps:$4 sm:$0xff]  }
 0x22b   : > { %v5051_v13 = vpop.f32.mrf.mxu0 }
 0x22c   : > { %v5052_v23 = vadd.f32 %v5051_v13, %v5050_v35  ;;  %v5539_v35 = vld [vmem:[%s7642_s8 + $0x3f4] ss:$28 sps:$4 sm:$0xff]   ;;  %v5542_v13 = vld [vmem:[%s7642_s8 + $0x3c] ss:$28 sps:$4 sm:$0xff]  }
 0x22e   : > { %v2267_v12 = vadd.f32 %v5052_v23, %v4729_v37  ;;  %v5537_v37 = vld [vmem:[%s7642_s8 + $0x3f0] ss:$28 sps:$4 sm:$0xff]   ;;  %v5548_v23 = vld [vmem:[%s7642_s8 + $0x4] ss:$28 sps:$4 sm:$0xff]  }
 0x26e   : > { %v5069_v38 = vpop.f32.mrf.mxu1 }
 0x270   : > { %v5070_v39 = vpop.f32.mrf.mxu1 }
 0x271   : > { %v5071_v26 = vadd.f32 %v5070_v39, %v5069_v38  ;;  %v5545_v38 = vld [vmem:[%s7642_s8 + $0x3bc] ss:$28 sps:$4 sm:$0xff]  }
 0x272   : > { %v5072_v40 = vpop.f32.mrf.mxu1  ;;  %v5540_v39 = vld [vmem:[%s7642_s8 + $0x38] ss:$28 sps:$4 sm:$0xff]  }
 0x273   : > { %v2305_v41 = vadd.f32 %v5071_v26, %v2264_v54  ;;  %v5543_v54 = vld [vmem:[%s7642_s8 + $0x3b8] ss:$28 sps:$4 sm:$0xff]   ;;  %v5551_v26 = vld [vmem:[%s7642_s8 + $0x384] ss:$28 sps:$4 sm:$0xff]  }
 0x274   : > { %v5073_v42 = vpop.f32.mrf.mxu1 }
 0x275   : > { %v2311_v43 = vmul.f32 0.5, %v2305_v41  ;;  %v5074_v21 = vadd.f32 %v5073_v42, %v5072_v40  ;;  %v5546_v40 = vld [vmem:[%s7642_s8] ss:$28 sps:$4 sm:$0xff]   ;;  %v5554_v42 = vld [vmem:[%s7642_s8 + $0x34c] ss:$28 sps:$4 sm:$0xff]  }
 0x277   : > { %v2313_v45 = vmul.f32 1.442695, %v2311_v43  ;;  %v2308_v46 = vadd.f32 %v5074_v21, %v2267_v12  ;;  %v5557_v12 = vld [vmem:[%s7642_s8 + $0x6cc] ss:$28 sps:$4 sm:$0xff]  }
 0x278   : > { %v5552_v43 = vld [vmem:[%s7642_s8 + $0x348] ss:$28 sps:$4 sm:$0xff]  }
 0x279   : > { %5824 = vpow2.f32 %v2313_v45  ;;  %v2312_v44 = vmul.f32 0.5, %v2308_v46  ;;  %v5555_v21 = vld [vmem:[%s7642_s8 + $0x6c8] ss:$28 sps:$4 sm:$0xff]   ;;  %v5560_v45 = vld [vmem:[%s7642_s8 + $0x314] ss:$28 sps:$4 sm:$0xff]  }
 0x27b   : > { %v2315_v51 = vmul.f32 1.442695, %v2312_v44  ;;  %v5558_v44 = vld [vmem:[%s7642_s8 + $0x310] ss:$28 sps:$4 sm:$0xff]  }
 0x27d   : > { %5826 = vpow2.f32 %v2315_v51  ;;  %v5569_v51 = vld [vmem:[%s7642_s8 + $0x65c] ss:$28 sps:$4 sm:$0xff]  }
 0x286   : > { %v5825_v62 = vpop.eup %5824 }
 0x287   : > { %v2327_v63 = vmul.f32 %v5825_v62, %v2322_v59  ;;  %v5578_v59 = vld [vmem:[%s7642_s8 + $0x26c] ss:$28 sps:$4 sm:$0xff]  }
 0x288   : > { %v5579_v62 = vld [vmem:[%s7642_s8 + $0x5e8] ss:$28 sps:$4 sm:$0xff]  }
 0x289   : > { %2331 = vrot.lane.b32.xlu1 %v2327_v63, %s5948_s20  ;;  %v5584_v63 = vld [vmem:[%s7642_s8 + $0x234] ss:$28 sps:$4 sm:$0xff]  }
 0x28a   : > { %v5827_v1 = vpop.eup %5826 }
 0x28b   : > { %v2328_v2 = vmul.f32 %v5827_v1, %v2324_v0  ;;  %v5587_v0 = vld [vmem:[%s7642_s8 + $0x5b4] ss:$28 sps:$4 sm:$0xff]  }
 0x28c   : > { %v5582_v1 = vld [vmem:[%s7642_s8 + $0x230] ss:$28 sps:$4 sm:$0xff]  }
 0x28d   : > { %2333 = vrot.lane.b32.xlu1 %v2328_v2, %s5948_s20  ;;  %v5585_v2 = vld [vmem:[%s7642_s8 + $0x5b0] ss:$28 sps:$4 sm:$0xff]  }
 0x2fb   : > { %v2332_v3 = vpop.permute.xlu1 %2331 }
 0x2fc   : > { %v2337_v6 = vadd.f32 %v2332_v3, %v2305_v41  ;;  %v5549_v41 = vld [vmem:[%s7642_s8 + $0x380] ss:$28 sps:$4 sm:$0xff]  }
 0x2fd   : > { %v5590_v3 = vld [vmem:[%s7642_s8 + $0x1fc] ss:$28 sps:$4 sm:$0xff]  }
 0x2ff   : > { %v2334_v5 = vpop.permute.xlu1 %2333 }
 0x300   : > { %v2338_v9 = vadd.f32 %v2334_v5, %v2308_v46  ;;  %v5563_v46 = vld [vmem:[%s7642_s8 + $0x694] ss:$28 sps:$4 sm:$0xff]   ;;  %v5593_v5 = vld [vmem:[%s7642_s8 + $0x57c] ss:$28 sps:$4 sm:$0xff]  }
 0x302   : > { %v2339_v15 = vpack.c.bf16 %v2338_v9, %v2337_v6  ;;  %v5588_v6 = vld [vmem:[%s7642_s8 + $0x1f8] ss:$28 sps:$4 sm:$0xff]  }
 0x303   : > { %v5591_v9 = vld [vmem:[%s7642_s8 + $0x578] ss:$28 sps:$4 sm:$0xff]  }
 0x304   : > { %4770 = vmatmul.mubr.msk.bf16.vlgmr.msra.gmra.mxu0 %vm2410_vm1, %v2339_v15  ;;  %4771 = vmatmul.mubr.msk.bf16.vlgmr.msra.gmra.mxu1 %vm2410_vm1, %v2339_v15  ;;  %v5594_v15 = vld [vmem:[%s7642_s8 + $0x1c0] ss:$28 sps:$4 sm:$0xff]  }
 0x305   : > { %3958 = vmatpush1.bf16.msra.mxu0 %v5504_v11  ;;  %4001 = vmatpush1.bf16.msra.mxu1 %v5507_v14  ;;  %v5596_v11 = vld [vmem:[%s7642_s8 + $0x1c4] ss:$28 sps:$4 sm:$0xff]  }
 0x306   : > { %3959 = vmatprep.subr.bf16.mxu0 %v5512_v16  ;;  %4002 = vmatprep.subr.bf16.mxu1 %v5515_v10  ;;  %v5599_v14 = vld [vmem:[%s7642_s8 + $0x544] ss:$28 sps:$4 sm:$0xff]   ;;  %v5602_v10 = vld [vmem:[%s7642_s8 + $0x194] ss:$28 sps:$4 sm:$0xff]  }
 0x307   : > { %v5597_v16 = vld [vmem:[%s7642_s8 + $0x540] ss:$28 sps:$4 sm:$0xff]  }
 0x309   : > { %3960 = vmatpush1.bf16.msra.mxu0 %v5510_v17  ;;  %4003 = vmatpush1.bf16.msra.mxu1 %v5513_v18  ;;  %v5605_v17 = vld [vmem:[%s7642_s8 + $0x514] ss:$28 sps:$4 sm:$0xff]   ;;  %v2348_v18 = vld [vmem:[%s7641_s7] sm:$0xf] }
 0x30a   : > { %3961 = vmatprep.subr.bf16.mxu0 %v5518_v19  ;;  %4004 = vmatprep.subr.bf16.mxu1 %v5521_v20 }
 0x30d   : > { %3962 = vmatpush1.bf16.msra.mxu0 %v5516_v22  ;;  %4005 = vmatpush1.bf16.msra.mxu1 %v5519_v24  ;;  %v2357_v22 = vrot.slane %v2348_v18, %v6801_v7  ;;  %v2365_v24 = vrot.slane %v2348_v18, %v6813_v48 }
 0x30e   : > { %3963 = vmatprep.subr.bf16.mxu0 %v5524_v25  ;;  %4006 = vmatprep.subr.bf16.mxu1 %v5527_v27  ;;  %v2353_v25 = vrot.slane %v2348_v18, %v6804_v8  ;;  %v2361_v27 = vrot.slane %v2348_v18, %v6816_v49  ;;  %v5644_v18 = vld [vmem:[%s7642_s8 + $0xc] ss:$28 sps:$4 sm:$0xff]  }
 0x311   : > { %3964 = vmatpush1.bf16.msra.mxu0 %v5522_v28  ;;  %4007 = vmatpush1.bf16.msra.mxu1 %v5525_v29 }
 0x312   : > { %3965 = vmatprep.subr.bf16.mxu0 %v5530_v30  ;;  %4008 = vmatprep.subr.bf16.mxu1 %v5533_v31 }
 0x315   : > { %3966 = vmatpush1.bf16.msra.mxu0 %v5528_v32  ;;  %4009 = vmatpush1.bf16.msra.mxu1 %v5531_v33 }
 0x316   : > { %3967 = vmatprep.subr.bf16.mxu0 %v5536_v34  ;;  %4010 = vmatprep.subr.bf16.mxu1 %v5539_v35 }
 0x319   : > { %3968 = vmatpush1.bf16.msra.mxu0 %v5534_v36  ;;  %4011 = vmatpush1.bf16.msra.mxu1 %v5537_v37 }
 0x31a   : > { %3969 = vmatprep.subr.bf16.mxu0 %v5542_v13  ;;  %4012 = vmatprep.subr.bf16.mxu1 %v5545_v38 }
 0x31d   : > { %3970 = vmatpush1.bf16.msra.mxu0 %v5540_v39  ;;  %4013 = vmatpush1.bf16.msra.mxu1 %v5543_v54 }
 0x31e   : > { %3971 = vmatprep.subr.bf16.mxu0 %v5548_v23  ;;  %4014 = vmatprep.subr.bf16.mxu1 %v5551_v26 }
 0x321   : > { %3972 = vmatpush1.bf16.msra.mxu0 %v5546_v40  ;;  %4015 = vmatpush1.bf16.msra.mxu1 %v5549_v41 }
 0x322   : > { %3973 = vmatprep.subr.bf16.mxu0 %v5554_v42  ;;  %4016 = vmatprep.subr.bf16.mxu1 %v5557_v12 }
 0x325   : > { %3974 = vmatpush2.bf16.msra.mxu0 %v5552_v43  ;;  %4017 = vmatpush2.bf16.msra.mxu1 %v5555_v21 }
 0x326   : > { %3975 = vmatprep.subr.bf16.mxu0 %v5560_v45  ;;  %4018 = vmatprep.subr.bf16.mxu1 %v5563_v46 }
 0x329   : > { %3976 = vmatpush2.bf16.msra.mxu0 %v5558_v44  ;;  %4019 = vmatpush2.bf16.msra.mxu1 %v5561_v47  ;;  %v5600_v44 = vld [vmem:[%s7642_s8 + $0x190] ss:$28 sps:$4 sm:$0xff]  }
 0x32a   : > { %3977 = vmatprep.subr.bf16.mxu0 %v5566_v50  ;;  %4020 = vmatprep.subr.bf16.mxu1 %v5569_v51  ;;  %v5603_v47 = vld [vmem:[%s7642_s8 + $0x510] ss:$28 sps:$4 sm:$0xff]  }
 0x32d   : > { %3978 = vmatpush2.bf16.msra.mxu0 %v5564_v52  ;;  %4021 = vmatpush2.bf16.msra.mxu1 %v5567_v53  ;;  %v5608_v52 = vld [vmem:[%s7642_s8 + $0x15c] ss:$28 sps:$4 sm:$0xff]  }
 0x32e   : > { %3979 = vmatprep.subr.bf16.mxu0 %v5572_v55  ;;  %4022 = vmatprep.subr.bf16.mxu1 %v5575_v56  ;;  %v5611_v53 = vld [vmem:[%s7642_s8 + $0x4dc] ss:$28 sps:$4 sm:$0xff]  }
 0x32f   : > { %v5606_v55 = vld [vmem:[%s7642_s8 + $0x158] ss:$28 sps:$4 sm:$0xff]  }
 0x330   : > { %v5609_v56 = vld [vmem:[%s7642_s8 + $0x4d8] ss:$28 sps:$4 sm:$0xff]  }
 0x331   : > { %3980 = vmatpush2.bf16.msra.mxu0 %v5570_v57  ;;  %4023 = vmatpush2.bf16.msra.mxu1 %v5573_v58  ;;  %v5614_v57 = vld [vmem:[%s7642_s8 + $0x124] ss:$28 sps:$4 sm:$0xff]  }
 0x332   : > { %3981 = vmatprep.subr.bf16.mxu0 %v5578_v59  ;;  %4024 = vmatprep.subr.bf16.mxu1 %v5581_v60  ;;  %v5617_v58 = vld [vmem:[%s7642_s8 + $0x4a4] ss:$28 sps:$4 sm:$0xff]  }
 0x333   : > { %v5612_v59 = vld [vmem:[%s7642_s8 + $0x120] ss:$28 sps:$4 sm:$0xff]  }
 0x334   : > { %v5615_v60 = vld [vmem:[%s7642_s8 + $0x4a0] ss:$28 sps:$4 sm:$0xff]  }
 0x335   : > { %3982 = vmatpush2.bf16.msra.mxu0 %v5576_v61  ;;  %4025 = vmatpush2.bf16.msra.mxu1 %v5579_v62  ;;  %v5620_v61 = vld [vmem:[%s7642_s8 + $0xec] ss:$28 sps:$4 sm:$0xff]  }
 0x336   : > { %3983 = vmatprep.subr.bf16.mxu0 %v5584_v63  ;;  %4026 = vmatprep.subr.bf16.mxu1 %v5587_v0  ;;  %v5623_v62 = vld [vmem:[%s7642_s8 + $0x46c] ss:$28 sps:$4 sm:$0xff]  }
 0x337   : > { %v5618_v63 = vld [vmem:[%s7642_s8 + $0xe8] ss:$28 sps:$4 sm:$0xff]  }
 0x338   : > { %v5621_v0 = vld [vmem:[%s7642_s8 + $0x468] ss:$28 sps:$4 sm:$0xff]  }
 0x339   : > { %3984 = vmatpush2.bf16.msra.mxu0 %v5582_v1  ;;  %4027 = vmatpush2.bf16.msra.mxu1 %v5585_v2  ;;  %v5626_v1 = vld [vmem:[%s7642_s8 + $0xb4] ss:$28 sps:$4 sm:$0xff]  }
 0x33a   : > { %3985 = vmatprep.subr.bf16.mxu0 %v5590_v3  ;;  %4028 = vmatprep.subr.bf16.mxu1 %v5593_v5  ;;  %v5629_v2 = vld [vmem:[%s7642_s8 + $0x434] ss:$28 sps:$4 sm:$0xff]  }
 0x33b   : > { %v5624_v3 = vld [vmem:[%s7642_s8 + $0xb0] ss:$28 sps:$4 sm:$0xff]  }
 0x33c   : > { %v5627_v5 = vld [vmem:[%s7642_s8 + $0x430] ss:$28 sps:$4 sm:$0xff]  }
 0x33d   : > { %3986 = vmatpush2.bf16.msra.mxu0 %v5588_v6  ;;  %4029 = vmatpush2.bf16.msra.mxu1 %v5591_v9  ;;  %v5632_v6 = vld [vmem:[%s7642_s8 + $0x7c] ss:$28 sps:$4 sm:$0xff]  }
 0x33e   : > { %3987 = vmatprep.subr.bf16.mxu0 %v5596_v11  ;;  %4030 = vmatprep.subr.bf16.mxu1 %v5599_v14  ;;  %v5635_v9 = vld [vmem:[%s7642_s8 + $0x3fc] ss:$28 sps:$4 sm:$0xff]  }
 0x33f   : > { %v5630_v11 = vld [vmem:[%s7642_s8 + $0x78] ss:$28 sps:$4 sm:$0xff]  }
 0x340   : > { %v5633_v14 = vld [vmem:[%s7642_s8 + $0x3f8] ss:$28 sps:$4 sm:$0xff]  }
 0x341   : > { %3988 = vmatpush2.bf16.msra.mxu0 %v5594_v15  ;;  %4031 = vmatpush2.bf16.msra.mxu1 %v5597_v16  ;;  %v5638_v15 = vld [vmem:[%s7642_s8 + $0x44] ss:$28 sps:$4 sm:$0xff]  }
 0x342   : > { %4043 = vmatprep.subr.bf16.mxu0 %v5602_v10  ;;  %4086 = vmatprep.subr.bf16.mxu1 %v5605_v17  ;;  %v5641_v16 = vld [vmem:[%s7642_s8 + $0x3c4] ss:$28 sps:$4 sm:$0xff]  }
 0x343   : > { %v5636_v10 = vld [vmem:[%s7642_s8 + $0x40] ss:$28 sps:$4 sm:$0xff]  }
 0x344   : > { %v5639_v17 = vld [vmem:[%s7642_s8 + $0x3c0] ss:$28 sps:$4 sm:$0xff]  }
 0x3c4   : > { %v2448_v19 = vpop.f32.mrf.mxu0  ;;  %v2491_v20 = vpop.f32.mrf.mxu1 }
 0x3c5   : > { %v2449_v36 = vadd.f32 %v2448_v19, %v2353_v25  ;;  %v2492_v37 = vadd.f32 %v2491_v20, %v2361_v27  ;;  %v5647_v19 = vld [vmem:[%s7642_s8 + $0x38c] ss:$28 sps:$4 sm:$0xff]  }
 0x3c6   : > { %v2450_v28 = vpop.f32.mrf.mxu0  ;;  %v2493_v29 = vpop.f32.mrf.mxu1  ;;  %v5642_v20 = vld [vmem:[%s7642_s8 + $0x8] ss:$28 sps:$4 sm:$0xff]  }
 0x3c7   : > { %v2451_v32 = vadd.f32 %v2450_v28, %v2357_v22  ;;  %v2494_v33 = vadd.f32 %v2493_v29, %v2365_v24  ;;  %v2500_v43 = vmax.f32 %v2449_v36, 0.0  ;;  %v2502_v21 = vmax.f32 %v2492_v37, 0.0  ;;  %v5651_v28 = vld [vmem:[%s7642_s8 + $0x6d0] ss:$28 sps:$4 sm:$0xff]   ;;  %v5656_v29 = vld [vmem:[%s7642_s8 + $0x31c] ss:$28 sps:$4 sm:$0xff]  }
 0x3c8   : > { %v2452_v30 = vpop.f32.mrf.mxu0  ;;  %v2495_v31 = vpop.f32.mrf.mxu1  ;;  %v5663_v36 = vld [vmem:[%s7642_s8 + $0x660] ss:$28 sps:$4 sm:$0xff]   ;;  %v5668_v37 = vld [vmem:[%s7642_s8 + $0x2ac] ss:$28 sps:$4 sm:$0xff]  }
 0x3c9   : > { %v2453_v34 = vadd.f32 %v2452_v30, %v2353_v25  ;;  %v2496_v35 = vadd.f32 %v2495_v31, %v2361_v27  ;;  %v2501_v40 = vmax.f32 %v2451_v32, 0.0  ;;  %v2503_v41 = vmax.f32 %v2494_v33, 0.0  ;;  %v5653_v25 = vld [vmem:[%s7642_s8 + $0x6d4] ss:$28 sps:$4 sm:$0xff]   ;;  %v5659_v30 = vld [vmem:[%s7642_s8 + $0x69c] ss:$28 sps:$4 sm:$0xff]  }
 0x3ca   : > { %v2454_v13 = vpop.f32.mrf.mxu0  ;;  %v2497_v38 = vpop.f32.mrf.mxu1  ;;  %v5648_v27 = vld [vmem:[%s7642_s8 + $0x350] ss:$28 sps:$4 sm:$0xff]   ;;  %v5654_v31 = vld [vmem:[%s7642_s8 + $0x318] ss:$28 sps:$4 sm:$0xff]   ;;  %v5662_v33 = vld [vmem:[%s7642_s8 + $0x2e4] ss:$28 sps:$4 sm:$0xff]  }
 0x3cb   : > { %v2455_v39 = vadd.f32 %v2454_v13, %v2357_v22  ;;  %v2498_v54 = vadd.f32 %v2497_v38, %v2365_v24  ;;  %v2504_v23 = vmax.f32 %v2453_v34, 0.0  ;;  %v2506_v26 = vmax.f32 %v2496_v35, 0.0  ;;  %v5645_v22 = vld [vmem:[%s7642_s8 + $0x388] ss:$28 sps:$4 sm:$0xff]   ;;  %v5650_v24 = vld [vmem:[%s7642_s8 + $0x354] ss:$28 sps:$4 sm:$0xff]  }
 0x3cc   : > { %v5657_v32 = vld [vmem:[%s7642_s8 + $0x698] ss:$28 sps:$4 sm:$0xff]   ;;  %v5665_v34 = vld [vmem:[%s7642_s8 + $0x664] ss:$28 sps:$4 sm:$0xff]   ;;  %v5671_v13 = vld [vmem:[%s7642_s8 + $0x62c] ss:$28 sps:$4 sm:$0xff]  }
 0x3cd   : > { %v2505_v42 = vmax.f32 %v2455_v39, 0.0  ;;  %v2507_v12 = vmax.f32 %v2498_v54, 0.0  ;;  %v7063_v50 = vpack.c.bf16 %v2504_v23, %v2500_v43  ;;  %v7065_v51 = vpack.c.bf16 %v2506_v26, %v2502_v21  ;;  %v5660_v35 = vld [vmem:[%s7642_s8 + $0x2e0] ss:$28 sps:$4 sm:$0xff]   ;;  %v5666_v38 = vld [vmem:[%s7642_s8 + $0x2a8] ss:$28 sps:$4 sm:$0xff]  }
 0x3ce   : > { %v5669_v39 = vld [vmem:[%s7642_s8 + $0x628] ss:$28 sps:$4 sm:$0xff]   ;;  %v5674_v54 = vld [vmem:[%s7642_s8 + $0x274] ss:$28 sps:$4 sm:$0xff]  }
 0x3cf   : > { %v7053_v45 = vpack.c.bf16 %v2505_v42, %v2501_v40  ;;  %v7055_v46 = vpack.c.bf16 %v2507_v12, %v2503_v41  ;;  %v5677_v23 = vld [vmem:[%s7642_s8 + $0x5f4] ss:$28 sps:$4 sm:$0xff]   ;;  %v5680_v41 = vld [vmem:[%s7642_s8 + $0x23c] ss:$28 sps:$4 sm:$0xff]   ;;  %v5686_v21 = vld [vmem:[%s7642_s8 + $0x204] ss:$28 sps:$4 sm:$0xff]  }
 0x3d0   : > { %v5672_v26 = vld [vmem:[%s7642_s8 + $0x270] ss:$28 sps:$4 sm:$0xff]   ;;  %v5683_v42 = vld [vmem:[%s7642_s8 + $0x5bc] ss:$28 sps:$4 sm:$0xff]  }
 0x3d1   : > { %3989 = vmatprep.mubr.bf16.mxu0 %v7053_v45  ;;  %4032 = vmatprep.mubr.bf16.mxu1 %v7055_v46  ;;  %v5675_v40 = vld [vmem:[%s7642_s8 + $0x5f0] ss:$28 sps:$4 sm:$0xff]   ;;  %v5678_v12 = vld [vmem:[%s7642_s8 + $0x238] ss:$28 sps:$4 sm:$0xff]  }
 0x3d2   : > { %3990 = vmatmul.mubr.bf16.vlgmr.msra.gmra.mxu0 %v7063_v50  ;;  %4033 = vmatmul.mubr.bf16.vlgmr.msra.gmra.mxu1 %v7065_v51  ;;  %v5681_v43 = vld [vmem:[%s7642_s8 + $0x5b8] ss:$28 sps:$4 sm:$0xff]  }
 0x3d3   : > { %4044 = vmatpush1.bf16.msra.mxu0 %v5600_v44  ;;  %4087 = vmatpush1.bf16.msra.mxu1 %v5603_v47  ;;  %v5689_v44 = vld [vmem:[%s7642_s8 + $0x584] ss:$28 sps:$4 sm:$0xff]  }
 0x3d4   : > { %4075 = vmatprep.mubr.bf16.mxu0 %v7053_v45  ;;  %4118 = vmatprep.mubr.bf16.mxu1 %v7055_v46  ;;  %v5684_v47 = vld [vmem:[%s7642_s8 + $0x200] ss:$28 sps:$4 sm:$0xff]  }
 0x3d5   : > { %4045 = vmatprep.subr.bf16.mxu0 %v5608_v52  ;;  %4088 = vmatprep.subr.bf16.mxu1 %v5611_v53  ;;  %v5687_v52 = vld [vmem:[%s7642_s8 + $0x580] ss:$28 sps:$4 sm:$0xff]   ;;  %v5692_v53 = vld [vmem:[%s7642_s8 + $0x1cc] ss:$28 sps:$4 sm:$0xff]  }
 0x3d7   : > { %4046 = vmatpush1.bf16.msra.mxu0 %v5606_v55  ;;  %4089 = vmatpush1.bf16.msra.mxu1 %v5609_v56  ;;  %v5695_v55 = vld [vmem:[%s7642_s8 + $0x54c] ss:$28 sps:$4 sm:$0xff]  }
 0x3d8   : > { %4047 = vmatprep.subr.bf16.mxu0 %v5614_v57  ;;  %4090 = vmatprep.subr.bf16.mxu1 %v5617_v58  ;;  %v5690_v56 = vld [vmem:[%s7642_s8 + $0x1c8] ss:$28 sps:$4 sm:$0xff]   ;;  %v5698_v58 = vld [vmem:[%s7642_s8 + $0x19c] ss:$28 sps:$4 sm:$0xff]  }
 0x3d9   : > { %v5693_v57 = vld [vmem:[%s7642_s8 + $0x548] ss:$28 sps:$4 sm:$0xff]  }
 0x3db   : > { %4048 = vmatpush1.bf16.msra.mxu0 %v5612_v59  ;;  %4091 = vmatpush1.bf16.msra.mxu1 %v5615_v60  ;;  %v5701_v59 = vld [vmem:[%s7642_s8 + $0x51c] ss:$28 sps:$4 sm:$0xff]  }
 0x3dc   : > { %4049 = vmatprep.subr.bf16.mxu0 %v5620_v61  ;;  %4092 = vmatprep.subr.bf16.mxu1 %v5623_v62  ;;  %v5696_v60 = vld [vmem:[%s7642_s8 + $0x198] ss:$28 sps:$4 sm:$0xff]   ;;  %v5704_v62 = vld [vmem:[%s7642_s8 + $0x164] ss:$28 sps:$4 sm:$0xff]  }
 0x3dd   : > { %v5699_v61 = vld [vmem:[%s7642_s8 + $0x518] ss:$28 sps:$4 sm:$0xff]  }
 0x3df   : > { %4050 = vmatpush1.bf16.msra.mxu0 %v5618_v63  ;;  %4093 = vmatpush1.bf16.msra.mxu1 %v5621_v0  ;;  %v5707_v63 = vld [vmem:[%s7642_s8 + $0x4e4] ss:$28 sps:$4 sm:$0xff]  }
 0x3e0   : > { %4051 = vmatprep.subr.bf16.mxu0 %v5626_v1  ;;  %4094 = vmatprep.subr.bf16.mxu1 %v5629_v2  ;;  %v5702_v0 = vld [vmem:[%s7642_s8 + $0x160] ss:$28 sps:$4 sm:$0xff]   ;;  %v5710_v2 = vld [vmem:[%s7642_s8 + $0x12c] ss:$28 sps:$4 sm:$0xff]  }
 0x3e1   : > { %v5705_v1 = vld [vmem:[%s7642_s8 + $0x4e0] ss:$28 sps:$4 sm:$0xff]  }
 0x3e3   : > { %4052 = vmatpush1.bf16.msra.mxu0 %v5624_v3  ;;  %4095 = vmatpush1.bf16.msra.mxu1 %v5627_v5  ;;  %v5713_v3 = vld [vmem:[%s7642_s8 + $0x4ac] ss:$28 sps:$4 sm:$0xff]  }
 0x3e4   : > { %4053 = vmatprep.subr.bf16.mxu0 %v5632_v6  ;;  %4096 = vmatprep.subr.bf16.mxu1 %v5635_v9  ;;  %v5708_v5 = vld [vmem:[%s7642_s8 + $0x128] ss:$28 sps:$4 sm:$0xff]   ;;  %v5716_v9 = vld [vmem:[%s7642_s8 + $0xf4] ss:$28 sps:$4 sm:$0xff]  }
 0x3e5   : > { %v5711_v6 = vld [vmem:[%s7642_s8 + $0x4a8] ss:$28 sps:$4 sm:$0xff]  }
 0x3e7   : > { %4054 = vmatpush1.bf16.msra.mxu0 %v5630_v11  ;;  %4097 = vmatpush1.bf16.msra.mxu1 %v5633_v14  ;;  %v5719_v11 = vld [vmem:[%s7642_s8 + $0x474] ss:$28 sps:$4 sm:$0xff]  }
 0x3e8   : > { %4055 = vmatprep.subr.bf16.mxu0 %v5638_v15  ;;  %4098 = vmatprep.subr.bf16.mxu1 %v5641_v16  ;;  %v5714_v14 = vld [vmem:[%s7642_s8 + $0xf0] ss:$28 sps:$4 sm:$0xff]   ;;  %v5722_v16 = vld [vmem:[%s7642_s8 + $0xbc] ss:$28 sps:$4 sm:$0xff]  }
 0x3e9   : > { %v5717_v15 = vld [vmem:[%s7642_s8 + $0x470] ss:$28 sps:$4 sm:$0xff]  }
 0x3eb   : > { %4056 = vmatpush1.bf16.msra.mxu0 %v5636_v10  ;;  %4099 = vmatpush1.bf16.msra.mxu1 %v5639_v17  ;;  %v5725_v10 = vld [vmem:[%s7642_s8 + $0x43c] ss:$28 sps:$4 sm:$0xff]  }
 0x3ec   : > { %4057 = vmatprep.subr.bf16.mxu0 %v5644_v18  ;;  %4100 = vmatprep.subr.bf16.mxu1 %v5647_v19  ;;  %v5720_v17 = vld [vmem:[%s7642_s8 + $0xb8] ss:$28 sps:$4 sm:$0xff]   ;;  %v5728_v19 = vld [vmem:[%s7642_s8 + $0x84] ss:$28 sps:$4 sm:$0xff]  }
 0x3ed   : > { %v5723_v18 = vld [vmem:[%s7642_s8 + $0x438] ss:$28 sps:$4 sm:$0xff]  }
 0x3ef   : > { %4058 = vmatpush1.bf16.msra.mxu0 %v5642_v20  ;;  %4101 = vmatpush1.bf16.msra.mxu1 %v5645_v22  ;;  %v5731_v20 = vld [vmem:[%s7642_s8 + $0x404] ss:$28 sps:$4 sm:$0xff]  }
 0x3f0   : > { %4059 = vmatprep.subr.bf16.mxu0 %v5650_v24  ;;  %4102 = vmatprep.subr.bf16.mxu1 %v5653_v25  ;;  %v5726_v22 = vld [vmem:[%s7642_s8 + $0x80] ss:$28 sps:$4 sm:$0xff]   ;;  %v5734_v25 = vld [vmem:[%s7642_s8 + $0x4c] ss:$28 sps:$4 sm:$0xff]  }
 0x3f1   : > { %v5729_v24 = vld [vmem:[%s7642_s8 + $0x400] ss:$28 sps:$4 sm:$0xff]  }
 0x3f3   : > { %4060 = vmatpush2.bf16.msra.mxu0 %v5648_v27  ;;  %4103 = vmatpush2.bf16.msra.mxu1 %v5651_v28  ;;  %v5737_v27 = vld [vmem:[%s7642_s8 + $0x3cc] ss:$28 sps:$4 sm:$0xff]  }
 0x3f4   : > { %4061 = vmatprep.subr.bf16.mxu0 %v5656_v29  ;;  %4104 = vmatprep.subr.bf16.mxu1 %v5659_v30  ;;  %v5732_v28 = vld [vmem:[%s7642_s8 + $0x48] ss:$28 sps:$4 sm:$0xff]   ;;  %v5740_v30 = vld [vmem:[%s7642_s8 + $0x14] ss:$28 sps:$4 sm:$0xff]  }
 0x3f5   : > { %v5735_v29 = vld [vmem:[%s7642_s8 + $0x3c8] ss:$28 sps:$4 sm:$0xff]  }
 0x3f7   : > { %4062 = vmatpush2.bf16.msra.mxu0 %v5654_v31  ;;  %4105 = vmatpush2.bf16.msra.mxu1 %v5657_v32  ;;  %v5743_v31 = vld [vmem:[%s7642_s8 + $0x394] ss:$28 sps:$4 sm:$0xff]  }
 0x3f8   : > { %4063 = vmatprep.subr.bf16.mxu0 %v5662_v33  ;;  %4106 = vmatprep.subr.bf16.mxu1 %v5665_v34  ;;  %v5738_v32 = vld [vmem:[%s7642_s8 + $0x10] ss:$28 sps:$4 sm:$0xff]   ;;  %v5746_v34 = vld [vmem:[%s7642_s8 + $0x35c] ss:$28 sps:$4 sm:$0xff]  }
 0x3f9   : > { %v5741_v33 = vld [vmem:[%s7642_s8 + $0x390] ss:$28 sps:$4 sm:$0xff]  }
 0x3fb   : > { %4064 = vmatpush2.bf16.msra.mxu0 %v5660_v35  ;;  %4107 = vmatpush2.bf16.msra.mxu1 %v5663_v36  ;;  %v5749_v35 = vld [vmem:[%s7642_s8 + $0x6dc] ss:$28 sps:$4 sm:$0xff]  }
 0x3fc   : > { %4065 = vmatprep.subr.bf16.mxu0 %v5668_v37  ;;  %4108 = vmatprep.subr.bf16.mxu1 %v5671_v13  ;;  %v5744_v36 = vld [vmem:[%s7642_s8 + $0x358] ss:$28 sps:$4 sm:$0xff]   ;;  %v5752_v13 = vld [vmem:[%s7642_s8 + $0x324] ss:$28 sps:$4 sm:$0xff]  }
 0x3fd   : > { %v5747_v37 = vld [vmem:[%s7642_s8 + $0x6d8] ss:$28 sps:$4 sm:$0xff]  }
 0x3ff   : > { %4066 = vmatpush2.bf16.msra.mxu0 %v5666_v38  ;;  %4109 = vmatpush2.bf16.msra.mxu1 %v5669_v39  ;;  %v5755_v38 = vld [vmem:[%s7642_s8 + $0x6a4] ss:$28 sps:$4 sm:$0xff]  }
 0x400   : > { %4067 = vmatprep.subr.bf16.mxu0 %v5674_v54  ;;  %4110 = vmatprep.subr.bf16.mxu1 %v5677_v23  ;;  %v5750_v39 = vld [vmem:[%s7642_s8 + $0x320] ss:$28 sps:$4 sm:$0xff]   ;;  %v5758_v23 = vld [vmem:[%s7642_s8 + $0x2ec] ss:$28 sps:$4 sm:$0xff]  }
 0x401   : > { %v5753_v54 = vld [vmem:[%s7642_s8 + $0x6a0] ss:$28 sps:$4 sm:$0xff]  }
 0x403   : > { %4068 = vmatpush2.bf16.msra.mxu0 %v5672_v26  ;;  %4111 = vmatpush2.bf16.msra.mxu1 %v5675_v40  ;;  %v5761_v26 = vld [vmem:[%s7642_s8 + $0x66c] ss:$28 sps:$4 sm:$0xff]  }
 0x404   : > { %4069 = vmatprep.subr.bf16.mxu0 %v5680_v41  ;;  %4112 = vmatprep.subr.bf16.mxu1 %v5683_v42  ;;  %v5756_v40 = vld [vmem:[%s7642_s8 + $0x2e8] ss:$28 sps:$4 sm:$0xff]   ;;  %v5764_v42 = vld [vmem:[%s7642_s8 + $0x2b4] ss:$28 sps:$4 sm:$0xff]  }
 0x405   : > { %v5759_v41 = vld [vmem:[%s7642_s8 + $0x668] ss:$28 sps:$4 sm:$0xff]  }
 0x407   : > { %4070 = vmatpush2.bf16.msra.mxu0 %v5678_v12  ;;  %4113 = vmatpush2.bf16.msra.mxu1 %v5681_v43  ;;  %v5767_v12 = vld [vmem:[%s7642_s8 + $0x634] ss:$28 sps:$4 sm:$0xff]  }
 0x408   : > { %4071 = vmatprep.subr.bf16.mxu0 %v5686_v21  ;;  %4114 = vmatprep.subr.bf16.mxu1 %v5689_v44  ;;  %v5762_v43 = vld [vmem:[%s7642_s8 + $0x2b0] ss:$28 sps:$4 sm:$0xff]   ;;  %v5770_v44 = vld [vmem:[%s7642_s8 + $0x27c] ss:$28 sps:$4 sm:$0xff]  }
 0x409   : > { %v5765_v21 = vld [vmem:[%s7642_s8 + $0x630] ss:$28 sps:$4 sm:$0xff]  }
 0x40b   : > { %4072 = vmatpush2.bf16.msra.mxu0 %v5684_v47  ;;  %4115 = vmatpush2.bf16.msra.mxu1 %v5687_v52  ;;  %v5773_v47 = vld [vmem:[%s7642_s8 + $0x5fc] ss:$28 sps:$4 sm:$0xff]  }
 0x40c   : > { %4073 = vmatprep.subr.bf16.mxu0 %v5692_v53  ;;  %4116 = vmatprep.subr.bf16.mxu1 %v5695_v55  ;;  %v5768_v52 = vld [vmem:[%s7642_s8 + $0x278] ss:$28 sps:$4 sm:$0xff]   ;;  %v5776_v55 = vld [vmem:[%s7642_s8 + $0x244] ss:$28 sps:$4 sm:$0xff]  }
 0x40d   : > { %v5771_v53 = vld [vmem:[%s7642_s8 + $0x5f8] ss:$28 sps:$4 sm:$0xff]  }
 0x40f   : > { %4074 = vmatpush2.bf16.msra.mxu0 %v5690_v56  ;;  %4117 = vmatpush2.bf16.msra.mxu1 %v5693_v57  ;;  %v5779_v56 = vld [vmem:[%s7642_s8 + $0x5c4] ss:$28 sps:$4 sm:$0xff]  }
 0x410   : > { %4129 = vmatprep.subr.bf16.mxu0 %v5698_v58  ;;  %4172 = vmatprep.subr.bf16.mxu1 %v5701_v59  ;;  %v5774_v57 = vld [vmem:[%s7642_s8 + $0x240] ss:$28 sps:$4 sm:$0xff]   ;;  %v5782_v59 = vld [vmem:[%s7642_s8 + $0x20c] ss:$28 sps:$4 sm:$0xff]  }
 0x411   : > { %v5777_v58 = vld [vmem:[%s7642_s8 + $0x5c0] ss:$28 sps:$4 sm:$0xff]  }
 0x412   : > { %4076 = vmatmul.mubr.bf16.vlgmr.msra.gmra.mxu0 %v7063_v50  ;;  %4119 = vmatmul.mubr.bf16.vlgmr.msra.gmra.mxu1 %v7065_v51 }
 0x413   : > { %4130 = vmatpush1.bf16.msra.mxu0 %v5696_v60  ;;  %4161 = vmatprep.mubr.bf16.mxu0 %v7053_v45  ;;  %v5785_v60 = vld [vmem:[%s7642_s8 + $0x58c] ss:$28 sps:$4 sm:$0xff]  }
 0x414   : > { %4173 = vmatpush1.bf16.msra.mxu1 %v5699_v61  ;;  %4204 = vmatprep.mubr.bf16.mxu1 %v7055_v46  ;;  %v5780_v61 = vld [vmem:[%s7642_s8 + $0x208] ss:$28 sps:$4 sm:$0xff]  }
 0x415   : > { %4131 = vmatprep.subr.bf16.mxu0 %v5704_v62  ;;  %4174 = vmatprep.subr.bf16.mxu1 %v5707_v63  ;;  %v5783_v62 = vld [vmem:[%s7642_s8 + $0x588] ss:$28 sps:$4 sm:$0xff]   ;;  %v5788_v63 = vld [vmem:[%s7642_s8 + $0x1d4] ss:$28 sps:$4 sm:$0xff]  }
 0x417   : > { %4132 = vmatpush1.bf16.msra.mxu0 %v5702_v0  ;;  %v5791_v0 = vld [vmem:[%s7642_s8 + $0x554] ss:$28 sps:$4 sm:$0xff]  }
 0x418   : > { %4175 = vmatpush1.bf16.msra.mxu1 %v5705_v1  ;;  %4133 = vmatprep.subr.bf16.mxu0 %v5710_v2  ;;  %v5786_v1 = vld [vmem:[%s7642_s8 + $0x1d0] ss:$28 sps:$4 sm:$0xff]  }
 0x419   : > { %4176 = vmatprep.subr.bf16.mxu1 %v5713_v3  ;;  %v5789_v2 = vld [vmem:[%s7642_s8 + $0x550] ss:$28 sps:$4 sm:$0xff]   ;;  %v5792_v3 = vld [vmem:[%s7642_s8 + $0x360] ss:$28 sps:$4 sm:$0xff]  }
 0x41b   : > { %4134 = vmatpush1.bf16.msra.mxu0 %v5708_v5  ;;  %v5793_v5 = vld [vmem:[%s7642_s8 + $0x6e0] ss:$28 sps:$4 sm:$0xff]  }
 0x41c   : > { %4177 = vmatpush1.bf16.msra.mxu1 %v5711_v6  ;;  %4135 = vmatprep.subr.bf16.mxu0 %v5716_v9  ;;  %v5794_v6 = vld [vmem:[%s7642_s8 + $0x1a0] ss:$28 sps:$4 sm:$0xff]  }
 0x41d   : > { %4178 = vmatprep.subr.bf16.mxu1 %v5719_v11  ;;  %v5795_v9 = vld [vmem:[%s7642_s8 + $0x520] ss:$28 sps:$4 sm:$0xff]   ;;  %v5796_v11 = vld [vmem:[%s7642_s8 + $0x328] ss:$28 sps:$4 sm:$0xff]  }
 0x41f   : > { %4136 = vmatpush1.bf16.msra.mxu0 %v5714_v14  ;;  %v5797_v14 = vld [vmem:[%s7642_s8 + $0x6a8] ss:$28 sps:$4 sm:$0xff]  }
 0x420   : > { %4179 = vmatpush1.bf16.msra.mxu1 %v5717_v15  ;;  %4137 = vmatprep.subr.bf16.mxu0 %v5722_v16  ;;  %v5798_v15 = vld [vmem:[%s7642_s8 + $0x168] ss:$28 sps:$4 sm:$0xff]  }
 0x421   : > { %4180 = vmatprep.subr.bf16.mxu1 %v5725_v10  ;;  %v5799_v16 = vld [vmem:[%s7642_s8 + $0x4e8] ss:$28 sps:$4 sm:$0xff]   ;;  %v5800_v10 = vld [vmem:[%s7642_s8 + $0x2f0] ss:$28 sps:$4 sm:$0xff]  }
 0x423   : > { %4138 = vmatpush1.bf16.msra.mxu0 %v5720_v17  ;;  %v5801_v17 = vld [vmem:[%s7642_s8 + $0x670] ss:$28 sps:$4 sm:$0xff]  }
 0x424   : > { %4181 = vmatpush1.bf16.msra.mxu1 %v5723_v18  ;;  %4139 = vmatprep.subr.bf16.mxu0 %v5728_v19  ;;  %v5803_v18 = vld [vmem:[%s7642_s8 + $0x4b0] ss:$28 sps:$4 sm:$0xff]   ;;  %v5805_v19 = vld [vmem:[%s7642_s8 + $0x638] ss:$28 sps:$4 sm:$0xff]  }
 0x425   : > { %4182 = vmatprep.subr.bf16.mxu1 %v5731_v20  ;;  %v5806_v20 = vld [vmem:[%s7642_s8 + $0xf8] ss:$28 sps:$4 sm:$0xff]  }
 0x427   : > { %4140 = vmatpush1.bf16.msra.mxu0 %v5726_v22  ;;  %v5807_v22 = vld [vmem:[%s7642_s8 + $0x478] ss:$28 sps:$4 sm:$0xff]  }
 0x428   : > { %4183 = vmatpush1.bf16.msra.mxu1 %v5729_v24  ;;  %4141 = vmatprep.subr.bf16.mxu0 %v5734_v25  ;;  %v5808_v24 = vld [vmem:[%s7642_s8 + $0x280] ss:$28 sps:$4 sm:$0xff]  }
 0x429   : > { %4184 = vmatprep.subr.bf16.mxu1 %v5737_v27  ;;  %v5809_v25 = vld [vmem:[%s7642_s8 + $0x600] ss:$28 sps:$4 sm:$0xff]  }
 0x42a   : > { %v5810_v27 = vld [vmem:[%s7642_s8 + $0xc0] ss:$28 sps:$4 sm:$0xff]  }
 0x42b   : > { %4142 = vmatpush1.bf16.msra.mxu0 %v5732_v28  ;;  %v5811_v28 = vld [vmem:[%s7642_s8 + $0x440] ss:$28 sps:$4 sm:$0xff]  }
 0x42c   : > { %4185 = vmatpush1.bf16.msra.mxu1 %v5735_v29  ;;  %4143 = vmatprep.subr.bf16.mxu0 %v5740_v30  ;;  %v5812_v29 = vld [vmem:[%s7642_s8 + $0x248] ss:$28 sps:$4 sm:$0xff]  }
 0x42d   : > { %4186 = vmatprep.subr.bf16.mxu1 %v5743_v31  ;;  %v5813_v30 = vld [vmem:[%s7642_s8 + $0x5c8] ss:$28 sps:$4 sm:$0xff]  }
 0x42e   : > { %v5814_v31 = vld [vmem:[%s7642_s8 + $0x88] ss:$28 sps:$4 sm:$0xff]  }
 0x42f   : > { %4144 = vmatpush1.bf16.msra.mxu0 %v5738_v32  ;;  %v5815_v32 = vld [vmem:[%s7642_s8 + $0x408] ss:$28 sps:$4 sm:$0xff]  }
 0x430   : > { %4187 = vmatpush1.bf16.msra.mxu1 %v5741_v33  ;;  %4145 = vmatprep.subr.bf16.mxu0 %v5746_v34  ;;  %v5816_v33 = vld [vmem:[%s7642_s8 + $0x210] ss:$28 sps:$4 sm:$0xff]  }
 0x431   : > { %4188 = vmatprep.subr.bf16.mxu1 %v5749_v35  ;;  %v5817_v34 = vld [vmem:[%s7642_s8 + $0x590] ss:$28 sps:$4 sm:$0xff]  }
 0x432   : > { %v5818_v35 = vld [vmem:[%s7642_s8 + $0x50] ss:$28 sps:$4 sm:$0xff]  }
 0x433   : > { %4146 = vmatpush2.bf16.msra.mxu0 %v5744_v36  ;;  %v5819_v36 = vld [vmem:[%s7642_s8 + $0x3d0] ss:$28 sps:$4 sm:$0xff]  }
 0x434   : > { %4189 = vmatpush2.bf16.msra.mxu1 %v5747_v37  ;;  %4147 = vmatprep.subr.bf16.mxu0 %v5752_v13  ;;  %v5820_v37 = vld [vmem:[%s7642_s8 + $0x1d8] ss:$28 sps:$4 sm:$0xff]  }
 0x435   : > { %4190 = vmatprep.subr.bf16.mxu1 %v5755_v38  ;;  %v5821_v13 = vld [vmem:[%s7642_s8 + $0x558] ss:$28 sps:$4 sm:$0xff]  }
 0x436   : > { %v5822_v38 = vld [vmem:[%s7642_s8 + $0x18] ss:$28 sps:$4 sm:$0xff]  }
 0x437   : > { %4148 = vmatpush2.bf16.msra.mxu0 %v5750_v39  ;;  %v5823_v39 = vld [vmem:[%s7642_s8 + $0x398] ss:$28 sps:$4 sm:$0xff]  }
 0x438   : > { %4191 = vmatpush2.bf16.msra.mxu1 %v5753_v54  ;;  %4149 = vmatprep.subr.bf16.mxu0 %v5758_v23  ;;  %v7554_v54 = vld [vmem:[%s7643_s9] sm:$0x7f] }
 0x439   : > { %4192 = vmatprep.subr.bf16.mxu1 %v5761_v26  ;;  %v2773_v23 = vrot.slane %v7554_v54, %v6804_v8  ;;  %v2777_v26 = vrot.slane %v7554_v54, %v6801_v7 }
 0x43b   : > { %4150 = vmatpush2.bf16.msra.mxu0 %v5756_v40 }
 0x43c   : > { %4193 = vmatpush2.bf16.msra.mxu1 %v5759_v41  ;;  %4151 = vmatprep.subr.bf16.mxu0 %v5764_v42 }
 0x43d   : > { %4194 = vmatprep.subr.bf16.mxu1 %v5767_v12 }
 0x43f   : > { %4152 = vmatpush2.bf16.msra.mxu0 %v5762_v43 }
 0x440   : > { %4195 = vmatpush2.bf16.msra.mxu1 %v5765_v21  ;;  %4153 = vmatprep.subr.bf16.mxu0 %v5770_v44 }
 0x441   : > { %4196 = vmatprep.subr.bf16.mxu1 %v5773_v47 }
 0x443   : > { %4154 = vmatpush2.bf16.msra.mxu0 %v5768_v52 }
 0x444   : > { %4197 = vmatpush2.bf16.msra.mxu1 %v5771_v53  ;;  %4155 = vmatprep.subr.bf16.mxu0 %v5776_v55 }
 0x445   : > { %4198 = vmatprep.subr.bf16.mxu1 %v5779_v56 }
 0x447   : > { %4156 = vmatpush2.bf16.msra.mxu0 %v5774_v57 }
 0x448   : > { %4199 = vmatpush2.bf16.msra.mxu1 %v5777_v58  ;;  %4157 = vmatprep.subr.bf16.mxu0 %v5782_v59 }
 0x449   : > { %4200 = vmatprep.subr.bf16.mxu1 %v5785_v60 }
 0x44b   : > { %4158 = vmatpush2.bf16.msra.mxu0 %v5780_v61 }
 0x44c   : > { %4201 = vmatpush2.bf16.msra.mxu1 %v5783_v62  ;;  %4159 = vmatprep.subr.bf16.mxu0 %v5788_v63 }
 0x44d   : > { %4202 = vmatprep.subr.bf16.mxu1 %v5791_v0 }
 0x44f   : > { %4160 = vmatpush2.bf16.msra.mxu0 %v5786_v1 }
 0x450   : > { %4203 = vmatpush2.bf16.msra.mxu1 %v5789_v2  ;;  %5075 = vmatprep.subr.bf16.mxu0 %v5792_v3 }
 0x451   : > { %5097 = vmatprep.subr.bf16.mxu1 %v5793_v5 }
 0x452   : > { %4162 = vmatmul.mubr.bf16.vlgmr.msra.gmra.mxu0 %v7063_v50 }
 0x453   : > { %4205 = vmatmul.mubr.bf16.vlgmr.msra.gmra.mxu1 %v7065_v51  ;;  %5076 = vmatpush3.bf16.msra.mxu0 %v5794_v6 }
 0x454   : > { %4247 = vmatprep.mubr.bf16.mxu0 %v7053_v45  ;;  %5098 = vmatpush3.bf16.msra.mxu1 %v5795_v9  ;;  %v5802_v45 = vld [vmem:[%s7642_s8 + $0x130] ss:$28 sps:$4 sm:$0xff]  }
 0x455   : > { %4288 = vmatprep.mubr.bf16.mxu1 %v7055_v46  ;;  %5077 = vmatprep.subr.bf16.mxu0 %v5796_v11  ;;  %v5804_v46 = vld [vmem:[%s7642_s8 + $0x2b8] ss:$28 sps:$4 sm:$0xff]  }
 0x456   : > { %5099 = vmatprep.subr.bf16.mxu1 %v5797_v14 }
 0x457   : > { %5078 = vmatpush3.bf16.msra.mxu0 %v5798_v15 }
 0x458   : > { %5100 = vmatpush3.bf16.msra.mxu1 %v5799_v16  ;;  %5079 = vmatprep.subr.bf16.mxu0 %v5800_v10  ;;  %v2781_v10 = vrot.slane %v7554_v54, %v6816_v49 }
 0x459   : > { %5101 = vmatprep.subr.bf16.mxu1 %v5801_v17  ;;  %v2785_v17 = vrot.slane %v7554_v54, %v6813_v48 }
 0x45b   : > { %5080 = vmatpush3.bf16.msra.mxu0 %v5802_v45 }
 0x45c   : > { %5102 = vmatpush3.bf16.msra.mxu1 %v5803_v18  ;;  %5081 = vmatprep.subr.bf16.mxu0 %v5804_v46 }
 0x45d   : > { %5103 = vmatprep.subr.bf16.mxu1 %v5805_v19 }
 0x45f   : > { %5082 = vmatpush3.bf16.msra.mxu0 %v5806_v20 }
 0x460   : > { %5104 = vmatpush3.bf16.msra.mxu1 %v5807_v22  ;;  %5083 = vmatprep.subr.bf16.mxu0 %v5808_v24 }
 0x461   : > { %5105 = vmatprep.subr.bf16.mxu1 %v5809_v25 }
 0x463   : > { %5084 = vmatpush3.bf16.msra.mxu0 %v5810_v27 }
 0x464   : > { %5106 = vmatpush3.bf16.msra.mxu1 %v5811_v28  ;;  %5085 = vmatprep.subr.bf16.mxu0 %v5812_v29 }
 0x465   : > { %5107 = vmatprep.subr.bf16.mxu1 %v5813_v30 }
 0x467   : > { %5086 = vmatpush3.bf16.msra.mxu0 %v5814_v31 }
 0x468   : > { %5108 = vmatpush3.bf16.msra.mxu1 %v5815_v32  ;;  %5087 = vmatprep.subr.bf16.mxu0 %v5816_v33 }
 0x469   : > { %5109 = vmatprep.subr.bf16.mxu1 %v5817_v34 }
 0x46b   : > { %5088 = vmatpush3.bf16.msra.mxu0 %v5818_v35 }
 0x46c   : > { %5110 = vmatpush3.bf16.msra.mxu1 %v5819_v36  ;;  %5089 = vmatprep.subr.bf16.mxu0 %v5820_v37 }
 0x46d   : > { %5111 = vmatprep.subr.bf16.mxu1 %v5821_v13 }
 0x46f   : > { %5090 = vmatpush3.bf16.msra.mxu0 %v5822_v38 }
 0x470   : > { %5112 = vmatpush3.bf16.msra.mxu1 %v5823_v39 }
 0x472   : > { %4248 = vmatmul.mubr.bf16.vlgmr.msra.gmra.mxu0 %v7063_v50 }
 0x473   : > { %4289 = vmatmul.mubr.bf16.vlgmr.msra.gmra.mxu1 %v7065_v51 }
 0x492   : > { %v3991_v40 = vpop.f32.mrf.mxu0  ;;  %v4034_v41 = vpop.f32.mrf.mxu1 }
 0x493   : > { %v3992_v42 = vadd.f32 %v3991_v40, %v2773_v23 }
 0x494   : > { %v3993_v12 = vpop.f32.mrf.mxu0  ;;  %v4036_v43 = vpop.f32.mrf.mxu1 }
 0x495   : > { %v4035_v21 = vadd.f32 %v4034_v41, %v3992_v42  ;;  %v3994_v50 = vadd.f32 %v3993_v12, %v2777_v26 }
 0x496   : > { %v3995_v44 = vpop.f32.mrf.mxu0  ;;  %v4038_v51 = vpop.f32.mrf.mxu1 }
 0x497   : > { %v4996_v47 = vmul.f32 -1.442695, %v4035_v21  ;;  %v4037_v52 = vadd.f32 %v4036_v43, %v3994_v50  ;;  %v3996_v53 = vadd.f32 %v3995_v44, %v2773_v23 }
 0x498   : > { %v3997_v55 = vpop.f32.mrf.mxu0  ;;  %v4040_v58 = vpop.f32.mrf.mxu1 }
 0x499   : > { %5828 = vpow2.f32 %v4996_v47  ;;  %v4997_v56 = vmul.f32 -1.442695, %v4037_v52  ;;  %v4039_v57 = vadd.f32 %v4038_v51, %v3996_v53  ;;  %v3998_v8 = vadd.f32 %v3997_v55, %v2777_v26 }
 0x49a   : > { %v2788_v51 = vsub.s32 4, %v6798_v4  ;;  %v2792_v47 = vsub.s32 5, %v6798_v4 }
 0x49b   : > { %5830 = vpow2.f32 %v4997_v56  ;;  %v5003_v7 = vmul.f32 -1.442695, %v4039_v57  ;;  %v4041_v59 = vadd.f32 %v4040_v58, %v3998_v8 }
 0x49c   : > { %v2789_v52 = vrot.slane %v7554_v54, %v2788_v51  ;;  %v2793_v53 = vrot.slane %v7554_v54, %v2792_v47 }
 0x49d   : > { %5832 = vpow2.f32 %v5003_v7  ;;  %v5004_v60 = vmul.f32 -1.442695, %v4041_v59 }
 0x49f   : > { %5834 = vpow2.f32 %v5004_v60 }
 0x4a6   : > { %v5829_v61 = vpop.eup %5828 }
 0x4a7   : > { %v4339_v62 = vadd.f32 1.0, %v5829_v61 }
 0x4a8   : > { %v5831_v63 = vpop.eup %5830 }
 0x4a9   : > { %v4340_v0 = vadd.f32 1.0, %v5831_v63  ;;  %5836 = vrcp.f32 %v4339_v62 }
 0x4aa   : > { %v5833_v1 = vpop.eup %5832 }
 0x4ab   : > { %5838 = vrcp.f32 %v4340_v0  ;;  %v4346_v2 = vadd.f32 1.0, %v5833_v1 }
 0x4ac   : > { %v5835_v3 = vpop.eup %5834 }
 0x4ad   : > { %v4347_v5 = vadd.f32 1.0, %v5835_v3  ;;  %5840 = vrcp.f32 %v4346_v2 }
 0x4af   : > { %5842 = vrcp.f32 %v4347_v5 }
 0x4b6   : > { %v5837_v6 = vpop.eup %5836 }
 0x4b8   : > { %v5839_v9 = vpop.eup %5838 }
 0x4b9   : > { %v5023_v11 = vpack.c.bf16 %v5839_v9, %v5837_v6 }
 0x4ba   : > { %v5841_v14 = vpop.eup %5840 }
 0x4bb   : > { %4425 = vst [vmem:[%s7563_s30] sm:$0xff] %v5023_v11 }
 0x4bc   : > { %v5843_v15 = vpop.eup %5842 }
 0x4bd   : > { %v5027_v16 = vpack.c.bf16 %v5843_v15, %v5841_v14 }
 0x4bf   : > { %4430 = vst [vmem:[%s7563_s30 + $0x1c] sm:$0xff] %v5027_v16 }
 0x4d2   : > { %v4077_v45 = vpop.f32.mrf.mxu0  ;;  %v4120_v18 = vpop.f32.mrf.mxu1 }
 0x4d3   : > { %v4078_v46 = vadd.f32 %v4077_v45, %v2781_v10 }
 0x4d4   : > { %v4079_v19 = vpop.f32.mrf.mxu0  ;;  %v4122_v20 = vpop.f32.mrf.mxu1 }
 0x4d5   : > { %v4121_v22 = vadd.f32 %v4120_v18, %v4078_v46  ;;  %v4080_v24 = vadd.f32 %v4079_v19, %v2785_v17 }
 0x4d6   : > { %v4081_v25 = vpop.f32.mrf.mxu0  ;;  %v4124_v27 = vpop.f32.mrf.mxu1 }
 0x4d7   : > { %v4998_v28 = vmul.f32 -1.442695, %v4121_v22  ;;  %v4123_v29 = vadd.f32 %v4122_v20, %v4080_v24  ;;  %v4082_v30 = vadd.f32 %v4081_v25, %v2781_v10  ;;  %v2796_v20 = vsub.s32 6, %v6798_v4 }
 0x4d8   : > { %v4083_v31 = vpop.f32.mrf.mxu0  ;;  %v4126_v34 = vpop.f32.mrf.mxu1 }
 0x4d9   : > { %5844 = vpow2.f32 %v4998_v28  ;;  %v4999_v32 = vmul.f32 -1.442695, %v4123_v29  ;;  %v4125_v33 = vadd.f32 %v4124_v27, %v4082_v30  ;;  %v4084_v49 = vadd.f32 %v4083_v31, %v2785_v17 }
 0x4da   : > { %v2797_v25 = vrot.slane %v7554_v54, %v2796_v20 }
 0x4db   : > { %5846 = vpow2.f32 %v4999_v32  ;;  %v5005_v48 = vmul.f32 -1.442695, %v4125_v33  ;;  %v4127_v35 = vadd.f32 %v4126_v34, %v4084_v49 }
 0x4dd   : > { %5848 = vpow2.f32 %v5005_v48  ;;  %v5006_v36 = vmul.f32 -1.442695, %v4127_v35 }
 0x4df   : > { %5850 = vpow2.f32 %v5006_v36 }
 0x4e6   : > { %v5845_v37 = vpop.eup %5844 }
 0x4e7   : > { %v4341_v13 = vadd.f32 1.0, %v5845_v37 }
 0x4e8   : > { %v5847_v38 = vpop.eup %5846 }
 0x4e9   : > { %v4342_v39 = vadd.f32 1.0, %v5847_v38  ;;  %5852 = vrcp.f32 %v4341_v13 }
 0x4ea   : > { %v5849_v23 = vpop.eup %5848 }
 0x4eb   : > { %5854 = vrcp.f32 %v4342_v39  ;;  %v4348_v26 = vadd.f32 1.0, %v5849_v23 }
 0x4ec   : > { %v5851_v40 = vpop.eup %5850 }
 0x4ed   : > { %v4349_v41 = vadd.f32 1.0, %v5851_v40  ;;  %5856 = vrcp.f32 %v4348_v26 }
 0x4ef   : > { %5858 = vrcp.f32 %v4349_v41 }
 0x4f6   : > { %v5853_v42 = vpop.eup %5852 }
 0x4f8   : > { %v5855_v12 = vpop.eup %5854 }
 0x4f9   : > { %v5024_v43 = vpack.c.bf16 %v5855_v12, %v5853_v42 }
 0x4fa   : > { %v5857_v21 = vpop.eup %5856 }
 0x4fb   : > { %4426 = vst [vmem:[%s7563_s30 + $0x8] sm:$0xff] %v5024_v43 }
 0x4fc   : > { %v5859_v50 = vpop.eup %5858 }
 0x4fd   : > { %v5028_v44 = vpack.c.bf16 %v5859_v50, %v5857_v21 }
 0x4ff   : > { %4431 = vst [vmem:[%s7563_s30 + $0x24] sm:$0xff] %v5028_v44 }
 0x512   : > { %v4163_v55 = vpop.f32.mrf.mxu0 }
 0x513   : > { %v4164_v56 = vadd.f32 %v4163_v55, %v2789_v52  ;;  %v4206_v57 = vpop.f32.mrf.mxu1 }
 0x514   : > { %v4165_v8 = vpop.f32.mrf.mxu0 }
 0x515   : > { %v4207_v58 = vadd.f32 %v4206_v57, %v4164_v56  ;;  %v4166_v7 = vadd.f32 %v4165_v8, %v2793_v53  ;;  %v4208_v59 = vpop.f32.mrf.mxu1 }
 0x516   : > { %v4167_v60 = vpop.f32.mrf.mxu0 }
 0x517   : > { %v5000_v61 = vmul.f32 -1.442695, %v4207_v58  ;;  %v4209_v62 = vadd.f32 %v4208_v59, %v4166_v7  ;;  %v4168_v63 = vadd.f32 %v4167_v60, %v2789_v52  ;;  %v4210_v0 = vpop.f32.mrf.mxu1 }
 0x518   : > { %v4169_v1 = vpop.f32.mrf.mxu0 }
 0x519   : > { %5860 = vpow2.f32 %v5000_v61  ;;  %v5001_v2 = vmul.f32 -1.442695, %v4209_v62  ;;  %v4211_v3 = vadd.f32 %v4210_v0, %v4168_v63  ;;  %v4170_v5 = vadd.f32 %v4169_v1, %v2793_v53  ;;  %v4212_v6 = vpop.f32.mrf.mxu1 }
 0x51b   : > { %5862 = vpow2.f32 %v5001_v2  ;;  %v5007_v9 = vmul.f32 -1.442695, %v4211_v3  ;;  %v4213_v11 = vadd.f32 %v4212_v6, %v4170_v5 }
 0x51d   : > { %5864 = vpow2.f32 %v5007_v9  ;;  %v5008_v14 = vmul.f32 -1.442695, %v4213_v11 }
 0x51f   : > { %5866 = vpow2.f32 %v5008_v14 }
 0x526   : > { %v5861_v15 = vpop.eup %5860 }
 0x527   : > { %v4343_v16 = vadd.f32 1.0, %v5861_v15 }
 0x528   : > { %v5863_v10 = vpop.eup %5862 }
 0x529   : > { %v4344_v17 = vadd.f32 1.0, %v5863_v10  ;;  %5868 = vrcp.f32 %v4343_v16 }
 0x52a   : > { %v5865_v45 = vpop.eup %5864 }
 0x52b   : > { %5870 = vrcp.f32 %v4344_v17  ;;  %v4350_v18 = vadd.f32 1.0, %v5865_v45 }
 0x52c   : > { %v5867_v46 = vpop.eup %5866 }
 0x52d   : > { %v4351_v19 = vadd.f32 1.0, %v5867_v46  ;;  %5872 = vrcp.f32 %v4350_v18 }
 0x52f   : > { %5874 = vrcp.f32 %v4351_v19 }
 0x532   : > { %v5091_v22 = vpop.f32.mrf.mxu0 }
 0x533   : > { %v5113_v24 = vpop.f32.mrf.mxu1 }
 0x534   : > { %v5092_v27 = vpop.f32.mrf.mxu0 }
 0x535   : > { %v5093_v28 = vadd.f32 %v5092_v27, %v5091_v22  ;;  %v5114_v29 = vpop.f32.mrf.mxu1 }
 0x536   : > { %v5094_v30 = vpop.f32.mrf.mxu0  ;;  %v5869_v31 = vpop.eup %5868  ;;  %v5115_v33 = vadd.f32 %v5114_v29, %v5113_v24 }
 0x537   : > { %v4250_v32 = vadd.f32 %v5093_v28, %v2797_v25  ;;  %v5116_v49 = vpop.f32.mrf.mxu1 }
 0x538   : > { %v5871_v34 = vpop.eup %5870  ;;  %v5095_v48 = vpop.f32.mrf.mxu0 }
 0x539   : > { %v5025_v35 = vpack.c.bf16 %v5871_v34, %v5869_v31  ;;  %v4291_v36 = vadd.f32 %v5115_v33, %v4250_v32  ;;  %v5096_v37 = vadd.f32 %v5095_v48, %v5094_v30  ;;  %v5117_v4 = vpop.f32.mrf.mxu1 }
 0x53a   : > { %v5873_v13 = vpop.eup %5872  ;;  %v5118_v39 = vadd.f32 %v5117_v4, %v5116_v49 }
 0x53b   : > { %4427 = vst [vmem:[%s7563_s30 + $0x10] sm:$0xff] %v5025_v35  ;;  %v5002_v38 = vmul.f32 -1.442695, %v4291_v36  ;;  %v4253_v54 = vadd.f32 %v5096_v37, %v2797_v25 }
 0x53c   : > { %v5875_v23 = vpop.eup %5874 }
 0x53d   : > { %v5029_v26 = vpack.c.bf16 %v5875_v23, %v5873_v13  ;;  %5876 = vpow2.f32 %v5002_v38  ;;  %v4294_v40 = vadd.f32 %v5118_v39, %v4253_v54 }
 0x53f   : > { %4432 = vst [vmem:[%s7563_s30 + $0x2c] sm:$0xff] %v5029_v26  ;;  %v5009_v41 = vmul.f32 -1.442695, %v4294_v40 }
 0x541   : > { %5878 = vpow2.f32 %v5009_v41 }
 0x54a   : > { %v5877_v42 = vpop.eup %5876 }
 0x54b   : > { %v4345_v12 = vadd.f32 1.0, %v5877_v42 }
 0x54d   : > { %5880 = vrcp.f32 %v4345_v12 }
 0x54e   : > { %v5879_v43 = vpop.eup %5878 }
 0x54f   : > { %v4352_v21 = vadd.f32 1.0, %v5879_v43 }
 0x551   : > { %5882 = vrcp.f32 %v4352_v21 }
 0x55a   : > { %v5881_v50 = vpop.eup %5880 }
 0x55b   : > { %v5026_v44 = vpack.c.bf16 %v5881_v50, %v5881_v50 }
 0x55d   : > { %4429 = vst.msk [vmem:[%s7563_s30 + $0x18] sm:$0xf] %vm4428_vm2, %v5026_v44 }
 0x55e   : > { %v5883_v51 = vpop.eup %5882 }
 0x55f   : > { %v5030_v47 = vpack.c.bf16 %v5883_v51, %v5883_v51 }
 0x561   : > { %4433 = vst.msk [vmem:[%s7563_s30 + $0x34] sm:$0xf] %vm4428_vm2, %v5030_v47 }
 0x562   : > { %5897 = shalt.err (!%p5894_p3)
}
 0x563   : > { %s5898_s25 = scalar_lea.hbm %s7587_s22, 896  ;;  %s5902_s30 = scalar_lea.hbm %s7644_s10, 1792 }
 0x564   : > { %p5899_p4 = scmp.ne.s32.totalorder %s7587_s22, %s5898_s25  ;;  %p5903_p9 = scmp.lt.s32.totalorder %s7587_s22, %s7644_s10 }
 0x565   : > { %p5904_p10 = scmp.lt.s32.totalorder %s5902_s30, %s5898_s25 }
 0x566   : > { %p5900_p7 = pnand %p5899_p4, %p6045_p5 }
 0x567   : > { %p5905_p11 = por %p5904_p10, %p5903_p9 }
 0x568   : > { %p5901_p8 = pneg %p5900_p7 }
 0x56a   : > { %p5906_p12 = pnand %p5905_p11, %p5901_p8 }
 0x56c   : > { %5909 = shalt.err (!%p5906_p12)
}
 0x56d   : > { %s5950_s20 = smov 448   ;;  %s5951_s17 = smov 28  }
 0x56e   : > { %5122 = dma.vmem_to_hbm [thread:$0]  (%p6045_p5), %s7589_s12, 896, %s7587_s22, %s7594_s28, %s5950_s20, %s5950_s20, %s5951_s17  }
 0x56f PF: > { %p5128_p13 = scmp.ge.s32.totalorder %s5944_s16, 2  ;;  %s4464_s29 = sand.u32 1, %s5932_s13  }
 0x570   : > { %s4465_s21 = scalar_lea.sflag [#allocation3], %s4464_s29 }
 0x571   : > { %p5125_p0 = pnand %p5128_p13, %p6049_p6 }
 0x573   : > { %p5126_p1 = pneg %p5125_p0 }
 0x575   : > { %5927 = dma.done.wait (%p5126_p1), %s4465_s21, 896  }
 0x576   : > { %5929 = vsyncadd (%p5126_p1), %s4465_s21, 4294966400  ;;  %s7650_s15 = sld [smem:[#allocation5_spill]]  ;;  %p20_p2 = scmp.ge.s32.totalorder %s6032_s19, 4  }
 0x577   : > { %s7651_s25 = sld [smem:[#allocation6_spill]]  ;;  %s7652_s13 = smov %s5936_s14 }
 0x578   : > { %s7655_s16 = smov %s6032_s19 }
 0x579   :  { %22 = sbr.rel (!%p20_p2) target bundleno = 3 (0x3), region = 98 }
 0x57c   : > { %s7653_s14 = smov %s7650_s15 }
 0x57d   : > { %s7654_s15 = smov %s7651_s25 }
 0x57e   :  { %4470 = vsyncpa [#allocation3], 1 }
 0x57f   :  { %4472 = vsyncpa [#allocation3 + $0x1], 1 }

</bundles_post_ra>
